<compile_context>
chip_gen: v7x
topology: tpu7x:2x2x1
jax: 0.10.0
libtpu: 0.0.40
codegen_flags: <defaults>
</compile_context>

<pallas_src>
import functools
import math

import jax
import jax.numpy as jnp
import numpy as np
from jax.experimental import pallas as pl
from jax.experimental.pallas import tpu as pltpu


def _round_up(x, m):
    return ((x + m - 1) // m) * m


def _vmem_budget_bytes():
    """<= 75% of physical per-core VMEM (v5e/v6e: 128 MiB, v7x: 64 MiB)."""
    cap = 64 * 1024 * 1024  # conservative fallback
    try:
        cap = int(getattr(pltpu.get_tpu_info(), "vmem_capacity_bytes", cap))
    except Exception:
        pass
    return int(0.75 * cap)


_VMEM_BUDGET = _vmem_budget_bytes()


def _pick_tile(total, quantum, cap):
    """Largest multiple of `quantum` that divides `total` and is <= cap."""
    best = quantum
    t = quantum
    while t <= min(total, cap):
        if total % t == 0:
            best = t
        t += quantum
    return best


# ------------------------- Path (A): fused implicit im2col -------------------------


def _fused_conv_kernel(x_ref, w_ref, b_ref, o_ref, pat_ref, *, kh, kw, oh, ow, c):
    """One padded NHWC image -> one (OH*OW, OC_pad) output tile.

    x_ref:   (Hp, Wp, C)        padded input image (compute dtype)
    w_ref:   (KH*KW*C, OC_pad)  binarized weight, VMEM-resident across the grid
    b_ref:   (1, OC_pad)        f32 bias row
    o_ref:   (OH*OW, OC_pad)    output tile (compute dtype)
    pat_ref: (OH, OW, KH*KW*C)  VMEM scratch holding the im2col patches
    """
    # Implicit im2col: KH*KW shifted (OH, OW, C) windows of the slab written
    # side-by-side along the last (lane) axis of the scratch.  stride/dilation
    # are 1 on this path, so every window is a plain static slice.
    for i in range(kh):
        for j in range(kw):
            c0 = (i * kw + j) * c
            pat_ref[:, :, c0:c0 + c] = x_ref[i:i + oh, j:j + ow, :]
    # Single MXU GEMM against the resident +/-1 weight, f32 accumulation,
    # bias folded into the (bf16) store.  OW % sublane-tile == 0 is enforced in
    # the wrapper, so the reshape below is a layout no-op.
    pat = pat_ref[...].reshape(oh * ow, kh * kw * c)
    acc = jnp.dot(pat, w_ref[...], preferred_element_type=jnp.float32)
    o_ref[...] = (acc + b_ref[...]).astype(o_ref.dtype)


# ------------------------- Path (B): im2col + tiled GEMM ---------------------------


def _gemm_kernel(p_ref, w_ref, b_ref, o_ref, acc_ref):
    """out = patches @ sign(W) + bias; full OC resident, f32 accumulate over K."""
    kk = pl.program_id(1)

    @pl.when(kk == 0)
    def _():
        acc_ref[...] = jnp.zeros_like(acc_ref)

    acc_ref[...] += jnp.dot(p_ref[...], w_ref[...],
                            preferred_element_type=jnp.float32)

    @pl.when(kk == pl.num_programs(1) - 1)
    def _():
        o_ref[...] = (acc_ref[...] + b_ref[...]).astype(o_ref.dtype)


def _im2col(x, kh, kw, stride, padding, dilation):
    """x: (N, C, H, W) -> patches (N*OH*OW, C*KH*KW); K ordered as (C, KH, KW)."""
    n, c, h, w = x.shape
    sh, sw = stride
    ph, pw = padding
    dh, dw = dilation
    xp = jnp.pad(x, ((0, 0), (0, 0), (ph, ph), (pw, pw)))
    oh = (h + 2 * ph - dh * (kh - 1) - 1) // sh + 1
    ow = (w + 2 * pw - dw * (kw - 1) - 1) // sw + 1
    cols = []
    for i in range(kh):
        for j in range(kw):
            sl = xp[:, :,
                    i * dh: i * dh + (oh - 1) * sh + 1: sh,
                    j * dw: j * dw + (ow - 1) * sw + 1: sw]   # (N, C, OH, OW)
            cols.append(sl)
    pat = jnp.stack(cols, axis=0)                  # (KH*KW, N, C, OH, OW)
    pat = jnp.transpose(pat, (1, 3, 4, 2, 0))      # (N, OH, OW, C, KH*KW)
    pat = pat.reshape(n * oh * ow, c * kh * kw)    # K index = c*(KH*KW) + i*KW + j
    return pat, oh, ow


# ------------------------------------ wrapper --------------------------------------


def qconv2d_forward(x, weight, bias=None, *, stride=(1, 1), padding=(0, 0),
                    dilation=(1, 1), compute_dtype=jnp.bfloat16, out_dtype=None,
                    force_gemm=False):
    """QConv2d forward: conv2d(x, sign(W), bias) in NCHW / OIHW convention."""
    if isinstance(stride, int):
        stride = (stride, stride)
    if isinstance(padding, int):
        padding = (padding, padding)
    if isinstance(dilation, int):
        dilation = (dilation, dilation)

    oc, ic, kh, kw = weight.shape
    n, c_in, h, w = x.shape
    assert c_in == ic, "groups != 1 not supported"   # TODO(synk): groups > 1
    sh, sw = stride
    ph, pw = padding
    dh, dw = dilation
    if out_dtype is None:
        out_dtype = x.dtype
    if bias is None:
        bias = jnp.zeros((oc,), jnp.float32)

    oh = (h + 2 * ph - dh * (kh - 1) - 1) // sh + 1
    ow = (w + 2 * pw - dw * (kw - 1) - 1) // sw + 1
    oc_pad = _round_up(oc, 128)                      # lane-dense OC (pad sliced off)
    el = jnp.dtype(compute_dtype).itemsize
    sub = 16 if el == 2 else 8                       # sublane tile for compute dtype
    kdim = kh * kw * ic

    # Binarize the weight ONCE.  Note: sign(0) == 0 (matches torch.sign).
    wb = jnp.sign(weight).astype(compute_dtype)      # +/-1 exact in bf16
    b_row = jnp.pad(bias.astype(jnp.float32).reshape(1, oc),
                    ((0, 0), (0, oc_pad - oc)))

    # ---------------- path selection -----------------------------------------------
    hp, wp = h + 2 * ph, w + 2 * pw
    fused_ok = (not force_gemm and sh == 1 and sw == 1 and dh == 1 and dw == 1
                and oh >= 1 and ow >= 1 and ow % sub == 0)
    if fused_ok:
        # VMEM working set (padded storage dims): 2x input slab, 2x output tile,
        # 2x resident weight, patches scratch, bias.
        x_blk = hp * _round_up(wp, sub) * _round_up(ic, 128) * el
        pat_blk = oh * _round_up(ow, sub) * _round_up(kdim, 128) * el
        o_blk = _round_up(oh * ow, sub) * oc_pad * el
        w_blk = _round_up(kdim, sub) * oc_pad * el
        ws = 2 * x_blk + pat_blk + 2 * o_blk + 2 * w_blk + 2 * oc_pad * 4
        fused_ok = ws <= int(0.9 * _VMEM_BUDGET)

    # ---------------- Path (A): fused implicit-im2col ------------------------------
    if fused_ok:
        xp = jnp.pad(jnp.transpose(x, (0, 2, 3, 1)).astype(compute_dtype),
                     ((0, 0), (ph, ph), (pw, pw), (0, 0)))      # (N, Hp, Wp, C)
        # Weight as (K, OC_pad) with K ordered (kh, kw, c) to match the scratch fill.
        w2 = jnp.transpose(wb, (2, 3, 1, 0)).reshape(kdim, oc)
        w2 = jnp.pad(w2, ((0, 0), (0, oc_pad - oc)))

        vmem_limit = int(min(max(2 * ws, 32 * 1024 * 1024), _VMEM_BUDGET))
        cost = pl.CostEstimate(
            flops=2 * n * oh * ow * kdim * oc_pad,
            transcendentals=0,
            bytes_accessed=int(n * hp * wp * ic * el + kdim * oc_pad * el
                               + n * oh * ow * oc_pad * el + oc_pad * 4))

        kern = functools.partial(_fused_conv_kernel,
                                 kh=kh, kw=kw, oh=oh, ow=ow, c=ic)
        out = pl.pallas_call(
            kern,
            out_shape=jax.ShapeDtypeStruct((n, oh * ow, oc_pad), compute_dtype),
            grid_spec=pltpu.PrefetchScalarGridSpec(
                num_scalar_prefetch=0,
                grid=(n,),
                in_specs=[
                    pl.BlockSpec((None, hp, wp, ic), lambda nn: (nn, 0, 0, 0)),
                    pl.BlockSpec((kdim, oc_pad), lambda nn: (0, 0)),   # resident W
                    pl.BlockSpec((1, oc_pad), lambda nn: (0, 0)),      # resident bias
                ],
                out_specs=pl.BlockSpec((None, oh * ow, oc_pad),
                                       lambda nn: (nn, 0, 0)),
                scratch_shapes=[pltpu.VMEM((oh, ow, kdim), compute_dtype)],
            ),
            compiler_params=pltpu.CompilerParams(
                dimension_semantics=("parallel",),
                vmem_limit_bytes=vmem_limit),
            cost_estimate=cost,
        )(xp, w2, b_row)

        out = out[:, :, :oc].reshape(n, oh, ow, oc)               # still bf16
        return jnp.transpose(out, (0, 3, 1, 2)).astype(out_dtype)  # NCHW, f32

    # ---------------- Path (B): im2col + tiled GEMM fallback ------------------------
    w2 = wb.reshape(oc, kdim).T                                   # K ordered (c, kh, kw)
    patches, oh, ow = _im2col(x.astype(compute_dtype), kh, kw,
                              stride, padding, dilation)
    m, kdim_ = patches.shape

    m_pad = _round_up(m, 128)
    k_pad = _round_up(kdim_, 128)
    tm = _pick_tile(m_pad, 128, 1024)
    tk = _pick_tile(k_pad, 128, 2048)

    def _ws(tm_, tk_):
        return (2 * tm_ * tk_ * el + 2 * tk_ * oc_pad * el
                + 2 * tm_ * oc_pad * el + tm_ * oc_pad * 4 + 2 * oc_pad * 4)

    while _ws(tm, tk) > _VMEM_BUDGET and (tm > 128 or tk > 128):
        if tm >= tk and tm > 128:
            tm = _pick_tile(m_pad, 128, tm - 128)
        else:
            tk = _pick_tile(k_pad, 128, tk - 128)

    if (m_pad, k_pad) != (m, kdim_):
        patches = jnp.pad(patches, ((0, m_pad - m), (0, k_pad - kdim_)))
    w2 = jnp.pad(w2, ((0, k_pad - kdim_), (0, oc_pad - oc)))

    grid = (m_pad // tm, k_pad // tk)
    vmem_limit = int(min(max(2 * _ws(tm, tk), 32 * 1024 * 1024), _VMEM_BUDGET))
    cost = pl.CostEstimate(
        flops=2 * m_pad * k_pad * oc_pad,
        transcendentals=0,
        bytes_accessed=int(m_pad * k_pad * el + k_pad * oc_pad * el
                           + m_pad * oc_pad * el + oc_pad * 4))

    out = pl.pallas_call(
        _gemm_kernel,
        out_shape=jax.ShapeDtypeStruct((m_pad, oc_pad), compute_dtype),
        grid_spec=pltpu.PrefetchScalarGridSpec(
            num_scalar_prefetch=0,
            grid=grid,
            in_specs=[
                pl.BlockSpec((tm, tk), lambda i, kk: (i, kk)),        # patches tile
                pl.BlockSpec((tk, oc_pad), lambda i, kk: (kk, 0)),    # weight K-slab
                pl.BlockSpec((1, oc_pad), lambda i, kk: (0, 0)),      # bias (resident)
            ],
            out_specs=pl.BlockSpec((tm, oc_pad), lambda i, kk: (i, 0)),
            scratch_shapes=[pltpu.VMEM((tm, oc_pad), jnp.float32)],
        ),
        compiler_params=pltpu.CompilerParams(
            dimension_semantics=("parallel", "arbitrary"),
            vmem_limit_bytes=vmem_limit),
        cost_estimate=cost,
    )(patches, w2, b_row)

    out = out[:m, :oc].reshape(n, oh, ow, oc)                      # still bf16
    return jnp.transpose(out, (0, 3, 1, 2)).astype(out_dtype)       # NCHW, f32


def _reference(x, weight, bias, stride, padding, dilation):
    """Plain-JAX f32 reference: conv2d with sign-binarized weights (NCHW/OIHW)."""
    wb = jnp.sign(weight)
    out = jax.lax.conv_general_dilated(
        x, wb,
        window_strides=stride,
        padding=[(padding[0], padding[0]), (padding[1], padding[1])],
        rhs_dilation=dilation,
        dimension_numbers=("NCHW", "OIHW", "NCHW"))
    return out + bias.reshape(1, -1, 1, 1)


if __name__ == "__main__":
    # Module config: QConv2d(in_channels=4, out_channels=8, kernel_size=3,
    #                        stride=1, padding=1, bias=True)
    in_channels, out_channels, ksize = 4, 8, 3

    key = jax.random.PRNGKey(0)
    kx, kw_ = jax.random.split(key)
    x = jax.random.normal(kx, (2, in_channels, 16, 16), dtype=jnp.float32)

    # xavier_normal_ for (OC, IC, KH, KW): std = sqrt(2 / (fan_in + fan_out))
    fan_in = in_channels * ksize * ksize
    fan_out = out_channels * ksize * ksize
    std = math.sqrt(2.0 / (fan_in + fan_out))
    weight = std * jax.random.normal(
        kw_, (out_channels, in_channels, ksize, ksize), dtype=jnp.float32)
    bias = jnp.zeros((out_channels,), dtype=jnp.float32)   # nn.init.constant_(bias, 0)

    # --- main config (stride=1, padding=1): exercises the fused implicit path ---
    fwd = jax.jit(functools.partial(qconv2d_forward,
                                    stride=(1, 1), padding=(1, 1), dilation=(1, 1)))
    out = jax.block_until_ready(fwd(x, weight, bias))
    ref = _reference(x, weight, bias, (1, 1), (1, 1), (1, 1))
    assert out.shape == (2, out_channels, 16, 16)
    # bf16 activations + bf16 writeback (weights +/-1 exact) vs f32 reference.
    np.testing.assert_allclose(np.asarray(out), np.asarray(ref),
                               rtol=5e-2, atol=1e-1)

    # --- strided config: exercises the im2col + GEMM fallback path --------------
    fwd2 = jax.jit(functools.partial(qconv2d_forward,
                                     stride=(2, 2), padding=(1, 1), dilation=(1, 1)))
    out2 = jax.block_until_ready(fwd2(x, weight, bias))
    ref2 = _reference(x, weight, bias, (2, 2), (1, 1), (1, 1))
    assert out2.shape == (2, out_channels, 8, 8)
    np.testing.assert_allclose(np.asarray(out2), np.asarray(ref2),
                               rtol=5e-2, atol=1e-1)

    print("KERNEL_OK")
</pallas_src>

<mosaic_0001>
module attributes {stable_mosaic.version = 11 : i64} {
  func.func @_fused_conv_kernel(%arg0: i32, %arg1: memref<1x18x18x4xbf16, #tpu.memory_space<vmem>>, %arg2: memref<36x128xbf16, #tpu.memory_space<vmem>>, %arg3: memref<1x128xf32, #tpu.memory_space<vmem>>, %arg4: memref<1x256x128xbf16, #tpu.memory_space<vmem>>, %arg5: memref<16x16x36xbf16, #tpu.memory_space<vmem>>) attributes {dimension_semantics = [#tpu.dimension_semantics<parallel>], iteration_bounds = array<i64: 2>, scalar_prefetch = 0 : i64, scratch_operands = 1 : i64, tpu.core_type = #tpu.core_type<tc>, window_params = [{transform_indices = @transform_0, window_bounds = array<i64: 1, 18, 18, 4>}, {pipeline_mode = #tpu.pipeline_mode<synchronous>, transform_indices = @transform_1, window_bounds = array<i64: 36, 128>}, {pipeline_mode = #tpu.pipeline_mode<synchronous>, transform_indices = @transform_2, window_bounds = array<i64: 1, 128>}, {transform_indices = @transform_3, window_bounds = array<i64: 1, 256, 128>}]} {
    %c0 = arith.constant 0 : index
    %c0_0 = arith.constant 0 : index
    %c0_1 = arith.constant 0 : index
    %c0_2 = arith.constant 0 : index
    %0 = vector.load %arg1[%c0, %c0_0, %c0_1, %c0_2] : memref<1x18x18x4xbf16, #tpu.memory_space<vmem>>, vector<1x16x16x4xbf16>
    %1 = vector.shape_cast %0 : vector<1x16x16x4xbf16> to vector<16x16x4xbf16>
    %c0_3 = arith.constant 0 : index
    %c0_4 = arith.constant 0 : index
    %c0_5 = arith.constant 0 : index
    %2 = vector.load %arg5[%c0_3, %c0_4, %c0_5] : memref<16x16x36xbf16, #tpu.memory_space<vmem>>, vector<16x16x4xbf16>
    tpu.vector_store %arg5[%c0_3, %c0_4, %c0_5], %1 {strides = array<i32>} : memref<16x16x36xbf16, #tpu.memory_space<vmem>>, vector<16x16x4xbf16>,
    %c0_6 = arith.constant 0 : index
    %c0_7 = arith.constant 0 : index
    %c1 = arith.constant 1 : index
    %c0_8 = arith.constant 0 : index
    %3 = vector.load %arg1[%c0_6, %c0_7, %c1, %c0_8] : memref<1x18x18x4xbf16, #tpu.memory_space<vmem>>, vector<1x16x16x4xbf16>
    %4 = vector.shape_cast %3 : vector<1x16x16x4xbf16> to vector<16x16x4xbf16>
    %c0_9 = arith.constant 0 : index
    %c0_10 = arith.constant 0 : index
    %c4 = arith.constant 4 : index
    %5 = vector.load %arg5[%c0_9, %c0_10, %c4] : memref<16x16x36xbf16, #tpu.memory_space<vmem>>, vector<16x16x4xbf16>
    tpu.vector_store %arg5[%c0_9, %c0_10, %c4], %4 {strides = array<i32>} : memref<16x16x36xbf16, #tpu.memory_space<vmem>>, vector<16x16x4xbf16>,
    %c0_11 = arith.constant 0 : index
    %c0_12 = arith.constant 0 : index
    %c2 = arith.constant 2 : index
    %c0_13 = arith.constant 0 : index
    %6 = vector.load %arg1[%c0_11, %c0_12, %c2, %c0_13] : memref<1x18x18x4xbf16, #tpu.memory_space<vmem>>, vector<1x16x16x4xbf16>
    %7 = vector.shape_cast %6 : vector<1x16x16x4xbf16> to vector<16x16x4xbf16>
    %c0_14 = arith.constant 0 : index
    %c0_15 = arith.constant 0 : index
    %c8 = arith.constant 8 : index
    %8 = vector.load %arg5[%c0_14, %c0_15, %c8] : memref<16x16x36xbf16, #tpu.memory_space<vmem>>, vector<16x16x4xbf16>
    tpu.vector_store %arg5[%c0_14, %c0_15, %c8], %7 {strides = array<i32>} : memref<16x16x36xbf16, #tpu.memory_space<vmem>>, vector<16x16x4xbf16>,
    %c0_16 = arith.constant 0 : index
    %c1_17 = arith.constant 1 : index
    %c0_18 = arith.constant 0 : index
    %c0_19 = arith.constant 0 : index
    %9 = vector.load %arg1[%c0_16, %c1_17, %c0_18, %c0_19] : memref<1x18x18x4xbf16, #tpu.memory_space<vmem>>, vector<1x16x16x4xbf16>
    %10 = vector.shape_cast %9 : vector<1x16x16x4xbf16> to vector<16x16x4xbf16>
    %c0_20 = arith.constant 0 : index
    %c0_21 = arith.constant 0 : index
    %c12 = arith.constant 12 : index
    %11 = vector.load %arg5[%c0_20, %c0_21, %c12] : memref<16x16x36xbf16, #tpu.memory_space<vmem>>, vector<16x16x4xbf16>
    tpu.vector_store %arg5[%c0_20, %c0_21, %c12], %10 {strides = array<i32>} : memref<16x16x36xbf16, #tpu.memory_space<vmem>>, vector<16x16x4xbf16>,
    %c0_22 = arith.constant 0 : index
    %c1_23 = arith.constant 1 : index
    %c1_24 = arith.constant 1 : index
    %c0_25 = arith.constant 0 : index
    %12 = vector.load %arg1[%c0_22, %c1_23, %c1_24, %c0_25] : memref<1x18x18x4xbf16, #tpu.memory_space<vmem>>, vector<1x16x16x4xbf16>
    %13 = vector.shape_cast %12 : vector<1x16x16x4xbf16> to vector<16x16x4xbf16>
    %c0_26 = arith.constant 0 : index
    %c0_27 = arith.constant 0 : index
    %c16 = arith.constant 16 : index
    %14 = vector.load %arg5[%c0_26, %c0_27, %c16] : memref<16x16x36xbf16, #tpu.memory_space<vmem>>, vector<16x16x4xbf16>
    tpu.vector_store %arg5[%c0_26, %c0_27, %c16], %13 {strides = array<i32>} : memref<16x16x36xbf16, #tpu.memory_space<vmem>>, vector<16x16x4xbf16>,
    %c0_28 = arith.constant 0 : index
    %c1_29 = arith.constant 1 : index
    %c2_30 = arith.constant 2 : index
    %c0_31 = arith.constant 0 : index
    %15 = vector.load %arg1[%c0_28, %c1_29, %c2_30, %c0_31] : memref<1x18x18x4xbf16, #tpu.memory_space<vmem>>, vector<1x16x16x4xbf16>
    %16 = vector.shape_cast %15 : vector<1x16x16x4xbf16> to vector<16x16x4xbf16>
    %c0_32 = arith.constant 0 : index
    %c0_33 = arith.constant 0 : index
    %c20 = arith.constant 20 : index
    %17 = vector.load %arg5[%c0_32, %c0_33, %c20] : memref<16x16x36xbf16, #tpu.memory_space<vmem>>, vector<16x16x4xbf16>
    tpu.vector_store %arg5[%c0_32, %c0_33, %c20], %16 {strides = array<i32>} : memref<16x16x36xbf16, #tpu.memory_space<vmem>>, vector<16x16x4xbf16>,
    %c0_34 = arith.constant 0 : index
    %c2_35 = arith.constant 2 : index
    %c0_36 = arith.constant 0 : index
    %c0_37 = arith.constant 0 : index
    %18 = vector.load %arg1[%c0_34, %c2_35, %c0_36, %c0_37] : memref<1x18x18x4xbf16, #tpu.memory_space<vmem>>, vector<1x16x16x4xbf16>
    %19 = vector.shape_cast %18 : vector<1x16x16x4xbf16> to vector<16x16x4xbf16>
    %c0_38 = arith.constant 0 : index
    %c0_39 = arith.constant 0 : index
    %c24 = arith.constant 24 : index
    %20 = vector.load %arg5[%c0_38, %c0_39, %c24] : memref<16x16x36xbf16, #tpu.memory_space<vmem>>, vector<16x16x4xbf16>
    tpu.vector_store %arg5[%c0_38, %c0_39, %c24], %19 {strides = array<i32>} : memref<16x16x36xbf16, #tpu.memory_space<vmem>>, vector<16x16x4xbf16>,
    %c0_40 = arith.constant 0 : index
    %c2_41 = arith.constant 2 : index
    %c1_42 = arith.constant 1 : index
    %c0_43 = arith.constant 0 : index
    %21 = vector.load %arg1[%c0_40, %c2_41, %c1_42, %c0_43] : memref<1x18x18x4xbf16, #tpu.memory_space<vmem>>, vector<1x16x16x4xbf16>
    %22 = vector.shape_cast %21 : vector<1x16x16x4xbf16> to vector<16x16x4xbf16>
    %c0_44 = arith.constant 0 : index
    %c0_45 = arith.constant 0 : index
    %c28 = arith.constant 28 : index
    %23 = vector.load %arg5[%c0_44, %c0_45, %c28] : memref<16x16x36xbf16, #tpu.memory_space<vmem>>, vector<16x16x4xbf16>
    tpu.vector_store %arg5[%c0_44, %c0_45, %c28], %22 {strides = array<i32>} : memref<16x16x36xbf16, #tpu.memory_space<vmem>>, vector<16x16x4xbf16>,
    %c0_46 = arith.constant 0 : index
    %c2_47 = arith.constant 2 : index
    %c2_48 = arith.constant 2 : index
    %c0_49 = arith.constant 0 : index
    %24 = vector.load %arg1[%c0_46, %c2_47, %c2_48, %c0_49] : memref<1x18x18x4xbf16, #tpu.memory_space<vmem>>, vector<1x16x16x4xbf16>
    %25 = vector.shape_cast %24 : vector<1x16x16x4xbf16> to vector<16x16x4xbf16>
    %c0_50 = arith.constant 0 : index
    %c0_51 = arith.constant 0 : index
    %c32 = arith.constant 32 : index
    %26 = vector.load %arg5[%c0_50, %c0_51, %c32] : memref<16x16x36xbf16, #tpu.memory_space<vmem>>, vector<16x16x4xbf16>
    tpu.vector_store %arg5[%c0_50, %c0_51, %c32], %25 {strides = array<i32>} : memref<16x16x36xbf16, #tpu.memory_space<vmem>>, vector<16x16x4xbf16>,
    %c0_52 = arith.constant 0 : index
    %c0_53 = arith.constant 0 : index
    %c0_54 = arith.constant 0 : index
    %27 = vector.load %arg5[%c0_52, %c0_53, %c0_54] : memref<16x16x36xbf16, #tpu.memory_space<vmem>>, vector<16x16x36xbf16>
    %28 = vector.shape_cast %27 : vector<16x16x36xbf16> to vector<256x36xbf16>
    %c0_55 = arith.constant 0 : index
    %c0_56 = arith.constant 0 : index
    %29 = vector.load %arg2[%c0_55, %c0_56] : memref<36x128xbf16, #tpu.memory_space<vmem>>, vector<36x128xbf16>
    %cst = arith.constant dense<0.000000e+00> : vector<256x128xf32>
    %30 = tpu.matmul %28, %29, %cst {dimension_numbers = #tpu.dot_dimension_numbers<[1], [0], [0], [1], [0, 0, 1, 1], [], []>} : vector<256x36xbf16>, vector<36x128xbf16>, vector<256x128xf32> -> vector<256x128xf32>
    %c0_57 = arith.constant 0 : index
    %c0_58 = arith.constant 0 : index
    %31 = vector.load %arg3[%c0_57, %c0_58] : memref<1x128xf32, #tpu.memory_space<vmem>>, vector<1x128xf32>
    %32 = vector.broadcast %31 : vector<1x128xf32> to vector<256x128xf32>
    %33 = arith.addf %30, %32 : vector<256x128xf32>
    %34 = arith.truncf %33 : vector<256x128xf32> to vector<256x128xbf16>
    %c0_59 = arith.constant 0 : index
    %c0_60 = arith.constant 0 : index
    %c0_61 = arith.constant 0 : index
    %35 = vector.load %arg4[%c0_59, %c0_60, %c0_61] : memref<1x256x128xbf16, #tpu.memory_space<vmem>>, vector<1x256x128xbf16>
    %36 = vector.shape_cast %35 : vector<1x256x128xbf16> to vector<256x128xbf16>
    %37 = vector.shape_cast %34 : vector<256x128xbf16> to vector<1x256x128xbf16>
    tpu.vector_store %arg4[%c0_59, %c0_60, %c0_61], %37 {strides = array<i32>} : memref<1x256x128xbf16, #tpu.memory_space<vmem>>, vector<1x256x128xbf16>,
    return
  }
  func.func @transform_0(%arg0: i32) -> (i32, i32, i32, i32) {
    %c0_i32 = arith.constant 0 : i32
    %c0_i32_0 = arith.constant 0 : i32
    %c0_i32_1 = arith.constant 0 : i32
    %c0_i32_2 = arith.constant 0 : i32
    return %arg0, %c0_i32, %c0_i32_0, %c0_i32_1 : i32, i32, i32, i32
  }
  func.func @transform_1(%arg0: i32) -> (i32, i32) {
    %c0_i32 = arith.constant 0 : i32
    %c0_i32_0 = arith.constant 0 : i32
    %c0_i32_1 = arith.constant 0 : i32
    return %c0_i32, %c0_i32_0 : i32, i32
  }
  func.func @transform_2(%arg0: i32) -> (i32, i32) {
    %c0_i32 = arith.constant 0 : i32
    %c0_i32_0 = arith.constant 0 : i32
    %c0_i32_1 = arith.constant 0 : i32
    return %c0_i32, %c0_i32_0 : i32, i32
  }
  func.func @transform_3(%arg0: i32) -> (i32, i32, i32) {
    %c0_i32 = arith.constant 0 : i32
    %c0_i32_0 = arith.constant 0 : i32
    %c0_i32_1 = arith.constant 0 : i32
    return %arg0, %c0_i32, %c0_i32_0 : i32, i32, i32
  }
}

</mosaic_0001>

<bundles_post_ra>
// kernel: qconv2d_forward.1
= control target key start
LH: loop header
LB: loop body
LE: loop exit
PB: predicated region body
PF: predicated region fallthrough
CT: control target
= control target key end

     0   :  { %s4360_s12 = smov 0   ;;  %s5083_s0 = inlined_call_operand.vmem [shape: bf16[2,18,18,4], index: 0, kind: input, shape index: {}]   ;;  %s5084_s1 = inlined_call_operand.vmem [shape: bf16[36,128], index: 1, kind: input, shape index: {}]   ;;  %s5085_s2 = inlined_call_operand.vmem [shape: f32[1,128], index: 2, kind: input, shape index: {}]   ;;  %s5086_s3 = inlined_call_operand.vmem [shape: bf16[2,256,128], index: 3, kind: output, shape index: {}]  }
   0x1 LB: > { %s3313_s13 = sadd.s32 4294967295, %s4330_s12   ;;  %p3317_p0 = scmp.ge.s32.totalorder %s4330_s12, 1  ;;  %s4330_s12 = sphi %s4360_s12, %s13_s12  }
   0x2   : > { %p137_p1 = scmp.lt.s32.totalorder %s4330_s12, 3 }
   0x4   : > { %p138_p2 = pnand %p3317_p0, %p137_p1 }
   0x5   : > { %p161_p3 = scmp.lt.s32.totalorder (!%p138_p2), %s3313_s13, 1  ;;  %vm927_vm0 = vcmask (!%p138_p2), 1046528   ;;  %s4332_s18 = smov (!%p138_p2), 12   ;;  %vm493_vm1 = vsmask.f32 (!%p138_p2), 7424  ;;  %vm300_vm2 = vcmask (!%p138_p2), 31744  }
   0x6   : > { %141 = sbr.rel (%p138_p2) target bundleno = 614 (0x266), region = 32  ;;  %s4333_s19 = smov (!%p138_p2), 8   ;;  %vm734_vm3 = vcmask (!%p138_p2), 64544   ;;  %vm1024_vm4 = vcmask (!%p138_p2), 97344   ;;  %vm1202_vm5 = vcmask (!%p138_p2), 130144   ;;  %vm1635_vm6 = vcmask (!%p138_p2), 162944  }
   0x7   : > { %s4334_s20 = smov (!%p138_p2), 4   ;;  %s4335_s21 = smov (!%p138_p2), 16   ;;  %vm1924_vm7 = vcmask (!%p138_p2), 195744   ;;  %vm2102_vm8 = vcmask (!%p138_p2), 228544   ;;  %vm2535_vm9 = vcmask (!%p138_p2), 261344   ;;  %vm2824_vm10 = vcmask (!%p138_p2), 294144  }
   0x8   : > { %s4336_s22 = smov (!%p138_p2), 20   ;;  %s4337_s23 = smov (!%p138_p2), 24   ;;  %vm2884_vm11 = vcmask (!%p138_p2), 293888   ;;  %vm2933_vm12 = vcmask (!%p138_p2), 1041408  }
   0x9   : > { %s4338_s24 = smov (!%p138_p2), 28   ;;  %s4339_s25 = smov (!%p138_p2), 32  }
   0xd   : > { %s5088_s13 = smov (!%p161_p3, %s3313_s13), 1 }
   0xe   : > { %s4064_s14 = smul.u32 216, %s5088_s13  ;;  %s3871_s7 = sshll.u32 %s5088_s13, 7 }
   0xf   : > { %s5034_s10 = scalar_lea.vmem %s5086_s3, %s3871_s7 }
  0x10   : > { %s4374_s17 = scalar_lea.vmem %s5083_s0, %s4064_s14 }
  0x11   : > { %v4081_v0 = vld [vmem:[%s4374_s17 + $0x6c] sm:$0xff]   ;;  %v4083_v2 = vld [vmem:[%s4374_s17 + $0x60] sm:$0xfe]   ;;  %v4084_v3 = vld [vmem:[%s4374_s17 + $0x68] ss:$0 sps:$4 sm:$0x11]  }
  0x12   : > { %v4082_v1 = vld [vmem:[%s4374_s17 + $0xc] sm:$0xff]   ;;  %1170 = vrot.lane.b32.xlu1 %v4081_v0, %s4332_s18  ;;  %v952_v5 = vrot.slane %v4083_v2, 1  ;;  %v953_v6 = vrot.slane %v4084_v3, 1  ;;  %v4085_v7 = vld [vmem:[%s4374_s17] sm:$0xfe]   ;;  %v4099_v58 = vld [vmem:[%s4374_s17 + $0x78] sm:$0xff]  }
  0x13   : > { %1154 = vrot.lane.b32.xlu0 %v4082_v1, %s4332_s18  ;;  %v4091_v4 = vld [vmem:[%s4374_s17 + $0xc] sm:$0xff]   ;;  %v4086_v8 = vld [vmem:[%s4374_s17 + $0x8] ss:$0 sps:$4 sm:$0x11]   ;;  %v928_v11 = vrot.slane %v4085_v7, 1  ;;  %v4093_v26 = vld [vmem:[%s4374_s17] sm:$0xff]  }
  0x14   : > { %v507_v9 = vshrl.u32 %v4091_v4, 16  ;;  %v954_v10 = vsel %vm927_vm0, %v952_v5, %v953_v6  ;;  %v4087_v12 = vld [vmem:[%s4374_s17 + $0x6c] sm:$0xfe]   ;;  %v509_v13 = vshll.u32 %v4091_v4, 16  ;;  %v929_v14 = vrot.slane %v4086_v8, 1  ;;  %v4097_v38 = vld [vmem:[%s4374_s17 + $0x60] sm:$0xff]  }
  0x15   : > { %v4088_v15 = vld [vmem:[%s4374_s17 + $0x74] ss:$0 sps:$4 sm:$0x11]   ;;  %v955_v16 = vrot.slane %v4087_v12, 1  ;;  %v4089_v20 = vld [vmem:[%s4374_s17 + $0xc] sm:$0xfe]  }
  0x16   : > { %992 = vrot.lane.b32.xlu1 %v954_v10, %s4333_s19  ;;  %v511_v17 = vrot.slane %v509_v13, 1  ;;  %v930_v18 = vsel %vm927_vm0, %v928_v11, %v929_v14  ;;  %v956_v19 = vrot.slane %v4088_v15, 1  ;;  %v4090_v21 = vld [vmem:[%s4374_s17 + $0x14] ss:$0 sps:$4 sm:$0x11]   ;;  %v931_v23 = vrot.slane %v4089_v20, 1 }
  0x17   : > { %976 = vrot.lane.b32.xlu0 %v930_v18, %s4333_s19  ;;  %v932_v24 = vrot.slane %v4090_v21, 1  ;;  %v4092_v25 = vld [vmem:[%s4374_s17 + $0x14] ss:$0 sps:$4 sm:$0x11]   ;;  %v495_v31 = vshrl.u32 %v4093_v26, 16  ;;  %v497_v32 = vshll.u32 %v4093_v26, 16 }
  0x18   : > { %v957_v22 = vsel %vm927_vm0, %v955_v16, %v956_v19  ;;  %v512_v27 = vor.u32 %v511_v17, %v507_v9  ;;  %v514_v29 = vshll.u32 %v4092_v25, 16  ;;  %v4094_v30 = vld [vmem:[%s4374_s17 + $0x8] ss:$0 sps:$4 sm:$0x11]   ;;  %v4095_v36 = vld [vmem:[%s4374_s17 + $0x6c] sm:$0xff]   ;;  %v591_v47 = vshrl.u32 %v4097_v38, 16 }
  0x19   : > { %v933_v28 = vsel %vm927_vm0, %v931_v23, %v932_v24  ;;  %v499_v34 = vrot.slane %v497_v32, 1  ;;  %v502_v35 = vshll.u32 %v4094_v30, 16  ;;  %v4096_v37 = vld [vmem:[%s4374_s17 + $0x74] ss:$0 sps:$4 sm:$0x11]   ;;  %v603_v42 = vshrl.u32 %v4095_v36, 16 }
  0x1a   : > { %994 = vrot.lane.b32.xlu1 %v957_v22, %s4333_s19  ;;  %v516_v33 = vrot.slane %v514_v29, 1  ;;  %v605_v43 = vshll.u32 %v4095_v36, 16  ;;  %v610_v44 = vshll.u32 %v4096_v37, 16  ;;  %v4098_v45 = vld [vmem:[%s4374_s17 + $0x68] ss:$0 sps:$4 sm:$0x11]  }
  0x1b   : > { %978 = vrot.lane.b32.xlu0 %v933_v28, %s4333_s19  ;;  %v500_v40 = vor.u32 %v499_v34, %v495_v31  ;;  %v504_v41 = vrot.slane %v502_v35, 1  ;;  %v593_v48 = vshll.u32 %v4097_v38, 16  ;;  %v598_v51 = vshll.u32 %v4098_v45, 16  ;;  %v4101_v53 = vld [vmem:[%s4374_s17 + $0x6c] sm:$0xff]   ;;  %v4100_v62 = vld [vmem:[%s4374_s17 + $0x18] sm:$0xff]  }
  0x1c   : > { %v517_v39 = vsel %vm493_vm1, %v512_v27, %v516_v33  ;;  %v607_v49 = vrot.slane %v605_v43, 1  ;;  %v612_v50 = vrot.slane %v610_v44, 1  ;;  %v4102_v56 = vld [vmem:[%s4374_s17 + $0x74] ss:$0 sps:$4 sm:$0x11]   ;;  %v1492_v59 = vshrl.u32 %v4101_v53, 16 }
  0x1d   : > { %v505_v46 = vsel %vm493_vm1, %v500_v40, %v504_v41  ;;  %v595_v52 = vrot.slane %v593_v48, 1  ;;  %v600_v55 = vrot.slane %v598_v51, 1  ;;  %v1494_v60 = vshll.u32 %v4101_v53, 16  ;;  %v4103_v0 = vld [vmem:[%s4374_s17 + $0xc] sm:$0xff]   ;;  %v4105_v7 = vld [vmem:[%s4374_s17 + $0x78] sm:$0xff]  }
  0x1e   : > { %688 = vrot.lane.b32.xlu1 %v517_v39, %s4334_s20  ;;  %v608_v54 = vor.u32 %v607_v49, %v603_v42  ;;  %v1499_v63 = vshll.u32 %v4102_v56, 16  ;;  %v4104_v3 = vld [vmem:[%s4374_s17 + $0x14] ss:$0 sps:$4 sm:$0x11]   ;;  %v1396_v5 = vshrl.u32 %v4103_v0, 16  ;;  %v1398_v6 = vshll.u32 %v4103_v0, 16 }
  0x1f   : > { %686 = vrot.lane.b32.xlu0 %v505_v46, %s4334_s20  ;;  %v596_v57 = vor.u32 %v595_v52, %v591_v47  ;;  %v1496_v2 = vrot.slane %v1494_v60, 1  ;;  %v1403_v9 = vshll.u32 %v4104_v3, 16  ;;  %v4106_v10 = vld [vmem:[%s4374_s17 + $0x80] ss:$0 sps:$4 sm:$0x11]   ;;  %v1504_v12 = vshrl.u32 %v4105_v7, 16 }
  0x20   : > { %v613_v61 = vsel %vm493_vm1, %v608_v54, %v612_v50  ;;  %v1501_v4 = vrot.slane %v1499_v63, 1  ;;  %v1400_v11 = vrot.slane %v1398_v6, 1  ;;  %v1506_v13 = vshll.u32 %v4105_v7, 16  ;;  %v4107_v14 = vld [vmem:[%s4374_s17 + $0x18] sm:$0xff]   ;;  %v4109_v28 = vld [vmem:[%s4374_s17 + $0x6c] sm:$0xfe]  }
  0x21   : > { %v601_v1 = vsel %vm493_vm1, %v596_v57, %v600_v55  ;;  %v1497_v8 = vor.u32 %v1496_v2, %v1492_v59  ;;  %v1405_v16 = vrot.slane %v1403_v9, 1  ;;  %v1511_v17 = vshll.u32 %v4106_v10, 16  ;;  %v4108_v20 = vld [vmem:[%s4374_s17 + $0x20] ss:$0 sps:$4 sm:$0x11]   ;;  %v4121_v49 = vld [vmem:[%s4374_s17 + $0x78] sm:$0xff]  }
  0x22   : > { %704 = vrot.lane.b32.xlu1 %v613_v61, %s4334_s20  ;;  %v1401_v18 = vor.u32 %v1400_v11, %v1396_v5  ;;  %v1508_v19 = vrot.slane %v1506_v13, 1  ;;  %v1408_v21 = vshrl.u32 %v4107_v14, 16  ;;  %v1410_v22 = vshll.u32 %v4107_v14, 16  ;;  %v4110_v29 = vld [vmem:[%s4374_s17 + $0x74] ss:$0 sps:$4 sm:$0x11]  }
  0x23   : > { %702 = vrot.lane.b32.xlu0 %v601_v1, %s4334_s20  ;;  %v1502_v15 = vsel %vm493_vm1, %v1497_v8, %v1501_v4  ;;  %v1513_v23 = vrot.slane %v1511_v17, 1  ;;  %v1415_v27 = vshll.u32 %v4108_v20, 16  ;;  %v1852_v33 = vrot.slane %v4109_v28, 1  ;;  %v4111_v34 = vld [vmem:[%s4374_s17 + $0xc] sm:$0xfe]   ;;  %v4123_v52 = vld [vmem:[%s4374_s17 + $0x18] sm:$0xff]  }
  0x24   : > { %v1406_v24 = vsel %vm493_vm1, %v1401_v18, %v1405_v16  ;;  %v1509_v25 = vor.u32 %v1508_v19, %v1504_v12  ;;  %v1412_v26 = vrot.slane %v1410_v22, 1  ;;  %v1853_v35 = vrot.slane %v4110_v29, 1  ;;  %v4112_v36 = vld [vmem:[%s4374_s17 + $0x14] ss:$0 sps:$4 sm:$0x11]   ;;  %v4117_v53 = vld [vmem:[%s4374_s17 + $0x78] sm:$0xff]  }
  0x25   : > { %v1417_v32 = vrot.slane %v1415_v27, 1  ;;  %v1828_v38 = vrot.slane %v4111_v34, 1  ;;  %v1829_v39 = vrot.slane %v4112_v36, 1  ;;  %v4113_v40 = vld [vmem:[%s4374_s17 + $0x78] sm:$0xfe]   ;;  %v2392_v56 = vshrl.u32 %v4121_v49, 16 }
  0x26   : > { %1172 = vrot.lane.b32.xlu1 %v4099_v58, %s4332_s18  ;;  %v1514_v30 = vsel %vm493_vm1, %v1509_v25, %v1513_v23  ;;  %v1413_v31 = vor.u32 %v1412_v26, %v1408_v21  ;;  %v4114_v41 = vld [vmem:[%s4374_s17 + $0x80] ss:$0 sps:$4 sm:$0x11]   ;;  %v1854_v42 = vsel %vm927_vm0, %v1852_v33, %v1853_v35  ;;  %v1855_v44 = vrot.slane %v4113_v40, 1  ;;  %v4115_v46 = vld [vmem:[%s4374_s17 + $0x18] sm:$0xfe]  }
  0x27   : > { %1156 = vrot.lane.b32.xlu0 %v4100_v62, %s4332_s18  ;;  %v1830_v43 = vsel %vm927_vm0, %v1828_v38, %v1829_v39  ;;  %v1856_v45 = vrot.slane %v4114_v41, 1  ;;  %v4116_v47 = vld [vmem:[%s4374_s17 + $0x20] ss:$0 sps:$4 sm:$0x11]   ;;  %v1831_v48 = vrot.slane %v4115_v46, 1  ;;  %v4118_v55 = vld [vmem:[%s4374_s17 + $0x18] sm:$0xff]  }
  0x28   : > { %v1418_v37 = vsel %vm493_vm1, %v1413_v31, %v1417_v32  ;;  %v1832_v51 = vrot.slane %v4116_v47, 1  ;;  %v2394_v57 = vshll.u32 %v4121_v49, 16  ;;  %v4122_v58 = vld [vmem:[%s4374_s17 + $0x80] ss:$0 sps:$4 sm:$0x11]   ;;  %v2296_v59 = vshrl.u32 %v4123_v52, 16 }
  0x29   : > { %v1857_v50 = vsel %vm927_vm0, %v1855_v44, %v1856_v45  ;;  %v2298_v61 = vshll.u32 %v4123_v52, 16  ;;  %v4119_v62 = vld [vmem:[%s4374_s17 + $0x84] sm:$0xff]   ;;  %v2399_v63 = vshll.u32 %v4122_v58, 16  ;;  %v4124_v0 = vld [vmem:[%s4374_s17 + $0x20] ss:$0 sps:$4 sm:$0x11]  }
  0x2a   : > { %1603 = vrot.lane.b32.xlu1 %v1502_v15, %s4335_s21  ;;  %v1833_v54 = vsel %vm927_vm0, %v1831_v48, %v1832_v51  ;;  %v2396_v60 = vrot.slane %v2394_v57, 1  ;;  %v4120_v1 = vld [vmem:[%s4374_s17 + $0x24] sm:$0xff]   ;;  %v2303_v5 = vshll.u32 %v4124_v0, 16  ;;  %v4126_v6 = vld [vmem:[%s4374_s17 + $0x8c] ss:$0 sps:$4 sm:$0x11]  }
  0x2b   : > { %1587 = vrot.lane.b32.xlu0 %v1406_v24, %s4335_s21  ;;  %v2300_v2 = vrot.slane %v2298_v61, 1  ;;  %v4125_v3 = vld [vmem:[%s4374_s17 + $0x84] sm:$0xff]   ;;  %v2401_v4 = vrot.slane %v2399_v63, 1  ;;  %v2411_v13 = vshll.u32 %v4126_v6, 16  ;;  %v4133_v14 = vld [vmem:[%s4374_s17 + $0x78] sm:$0xff]  }
  0x2c   : > { %v4127_v7 = vld [vmem:[%s4374_s17 + $0x24] sm:$0xff]   ;;  %v2397_v8 = vor.u32 %v2396_v60, %v2392_v56  ;;  %v2404_v9 = vshrl.u32 %v4125_v3, 16  ;;  %v2406_v10 = vshll.u32 %v4125_v3, 16  ;;  %v2305_v12 = vrot.slane %v2303_v5, 1  ;;  %v4129_v25 = vld [vmem:[%s4374_s17 + $0x78] sm:$0xfe]  }
  0x2d   : > { %v2301_v11 = vor.u32 %v2300_v2, %v2296_v59  ;;  %v4128_v16 = vld [vmem:[%s4374_s17 + $0x2c] ss:$0 sps:$4 sm:$0x11]   ;;  %v2308_v17 = vshrl.u32 %v4127_v7, 16  ;;  %v2310_v18 = vshll.u32 %v4127_v7, 16  ;;  %v2413_v19 = vrot.slane %v2411_v13, 1 }
  0x2e   : > { %1605 = vrot.lane.b32.xlu1 %v1514_v30, %s4335_s21  ;;  %v2408_v15 = vrot.slane %v2406_v10, 1  ;;  %v615_v20 = vshrl.u32 %v4133_v14, 16  ;;  %v2402_v21 = vsel %vm493_vm1, %v2397_v8, %v2401_v4  ;;  %v2315_v24 = vshll.u32 %v4128_v16, 16  ;;  %v4130_v27 = vld [vmem:[%s4374_s17 + $0x80] ss:$0 sps:$4 sm:$0x11]  }
  0x2f   : > { %1589 = vrot.lane.b32.xlu0 %v1418_v37, %s4335_s21  ;;  %v2312_v23 = vrot.slane %v2310_v18, 1  ;;  %v2306_v26 = vsel %vm493_vm1, %v2301_v11, %v2305_v12  ;;  %v617_v28 = vshll.u32 %v4133_v14, 16  ;;  %v2752_v31 = vrot.slane %v4129_v25, 1  ;;  %v4135_v32 = vld [vmem:[%s4374_s17 + $0x18] sm:$0xff]   ;;  %v4137_v51 = vld [vmem:[%s4374_s17 + $0x84] sm:$0xfe]  }
  0x30   : > { %v2409_v22 = vor.u32 %v2408_v15, %v2404_v9  ;;  %v2317_v30 = vrot.slane %v2315_v24, 1  ;;  %v2753_v33 = vrot.slane %v4130_v27, 1  ;;  %v4131_v34 = vld [vmem:[%s4374_s17 + $0x18] sm:$0xfe]   ;;  %v519_v46 = vshrl.u32 %v4135_v32, 16  ;;  %v4141_v52 = vld [vmem:[%s4374_s17 + $0x84] sm:$0xff]  }
  0x31   : > { %v2313_v29 = vor.u32 %v2312_v23, %v2308_v17  ;;  %v4132_v35 = vld [vmem:[%s4374_s17 + $0x20] ss:$0 sps:$4 sm:$0x11]   ;;  %v2728_v38 = vrot.slane %v4131_v34, 1  ;;  %v619_v41 = vrot.slane %v617_v28, 1  ;;  %v521_v47 = vshll.u32 %v4135_v32, 16 }
  0x32   : > { %1892 = vrot.lane.b32.xlu1 %v1854_v42, %s4336_s22  ;;  %v2414_v36 = vsel %vm493_vm1, %v2409_v22, %v2413_v19  ;;  %v2729_v39 = vrot.slane %v4132_v35, 1  ;;  %v4134_v40 = vld [vmem:[%s4374_s17 + $0x80] ss:$0 sps:$4 sm:$0x11]   ;;  %v2754_v44 = vsel %vm927_vm0, %v2752_v31, %v2753_v33  ;;  %v2755_v56 = vrot.slane %v4137_v51, 1  ;;  %v4143_v57 = vld [vmem:[%s4374_s17 + $0x24] sm:$0xff]  }
  0x33   : > { %1876 = vrot.lane.b32.xlu0 %v1830_v43, %s4336_s22  ;;  %v2318_v37 = vsel %vm493_vm1, %v2313_v29, %v2317_v30  ;;  %v622_v42 = vshll.u32 %v4134_v40, 16  ;;  %v4136_v43 = vld [vmem:[%s4374_s17 + $0x20] ss:$0 sps:$4 sm:$0x11]   ;;  %v620_v45 = vor.u32 %v619_v41, %v615_v20  ;;  %v4139_v61 = vld [vmem:[%s4374_s17 + $0x24] sm:$0xfe]  }
  0x34   : > { %v2730_v48 = vsel %vm927_vm0, %v2728_v38, %v2729_v39  ;;  %v2731_v0 = vrot.slane %v4139_v61, 1  ;;  %v4142_v2 = vld [vmem:[%s4374_s17 + $0x8c] ss:$0 sps:$4 sm:$0x11]   ;;  %v627_v3 = vshrl.u32 %v4141_v52, 16  ;;  %v629_v4 = vshll.u32 %v4141_v52, 16 }
  0x35   : > { %v624_v49 = vrot.slane %v622_v42, 1  ;;  %v634_v6 = vshll.u32 %v4142_v2, 16  ;;  %v4144_v7 = vld [vmem:[%s4374_s17 + $0x2c] ss:$0 sps:$4 sm:$0x11]   ;;  %v531_v10 = vshrl.u32 %v4143_v57, 16 }
  0x36   : > { %1894 = vrot.lane.b32.xlu1 %v1857_v50, %s4336_s22  ;;  %v526_v50 = vshll.u32 %v4136_v43, 16  ;;  %v631_v9 = vrot.slane %v629_v4, 1  ;;  %v533_v11 = vshll.u32 %v4143_v57, 16  ;;  %v538_v13 = vshll.u32 %v4144_v7, 16  ;;  %v4145_v16 = vld [vmem:[%s4374_s17 + $0x78] sm:$0xfe]  }
  0x37   : > { %1878 = vrot.lane.b32.xlu0 %v1833_v54, %s4336_s22  ;;  %v4138_v54 = vld [vmem:[%s4374_s17 + $0x8c] ss:$0 sps:$4 sm:$0x11]   ;;  %v625_v58 = vsel %vm493_vm1, %v620_v45, %v624_v49  ;;  %v636_v12 = vrot.slane %v634_v6, 1  ;;  %v4147_v23 = vld [vmem:[%s4374_s17 + $0x18] sm:$0xfe]  }
  0x38   : > { %v2756_v60 = vrot.slane %v4138_v54, 1  ;;  %v632_v14 = vor.u32 %v631_v9, %v627_v3  ;;  %v535_v15 = vrot.slane %v533_v11, 1  ;;  %v4146_v17 = vld [vmem:[%s4374_s17 + $0x80] ss:$0 sps:$4 sm:$0x11]   ;;  %v540_v18 = vrot.slane %v538_v13, 1 }
  0x39   : > { %v959_v22 = vrot.slane %v4146_v17, 1  ;;  %v4148_v24 = vld [vmem:[%s4374_s17 + $0x20] ss:$0 sps:$4 sm:$0x11]   ;;  %v4157_v27 = vld [vmem:[%s4374_s17 + $0x84] sm:$0xff]   ;;  %v4156_v51 = vld [vmem:[%s4374_s17 + $0x30] sm:$0xff]  }
  0x3a   : > { %2070 = vrot.lane.b32.xlu1 %v4117_v53, %s4337_s23  ;;  %v523_v53 = vrot.slane %v521_v47, 1  ;;  %v2757_v5 = vsel %vm927_vm0, %v2755_v56, %v2756_v60  ;;  %v637_v19 = vsel %vm493_vm1, %v632_v14, %v636_v12  ;;  %v536_v20 = vor.u32 %v535_v15, %v531_v10  ;;  %v4149_v30 = vld [vmem:[%s4374_s17 + $0x84] sm:$0xfe]   ;;  %v4150_v31 = vld [vmem:[%s4374_s17 + $0x8c] ss:$0 sps:$4 sm:$0x11]  }
  0x3b   : > { %2054 = vrot.lane.b32.xlu0 %v4118_v55, %s4337_s23  ;;  %v528_v55 = vrot.slane %v526_v50, 1  ;;  %v935_v29 = vrot.slane %v4148_v24, 1  ;;  %v961_v33 = vrot.slane %v4149_v30, 1  ;;  %v962_v34 = vrot.slane %v4150_v31, 1  ;;  %v4151_v35 = vld [vmem:[%s4374_s17 + $0x24] sm:$0xfe]  }
  0x3c   : > { %v524_v59 = vor.u32 %v523_v53, %v519_v46  ;;  %v541_v25 = vsel %vm493_vm1, %v536_v20, %v540_v18  ;;  %v937_v39 = vrot.slane %v4151_v35, 1  ;;  %v1518_v40 = vshll.u32 %v4157_v27, 16  ;;  %v4153_v42 = vld [vmem:[%s4374_s17 + $0x84] sm:$0xff]   ;;  %v4155_v50 = vld [vmem:[%s4374_s17 + $0x90] sm:$0xff]  }
  0x3d   : > { %v963_v38 = vsel %vm927_vm0, %v961_v33, %v962_v34  ;;  %v4159_v43 = vld [vmem:[%s4374_s17 + $0x24] sm:$0xff]   ;;  %v4160_v53 = vld [vmem:[%s4374_s17 + $0x2c] ss:$0 sps:$4 sm:$0x11]   ;;  %v4171_v30 = vld [vmem:[%s4374_s17 + $0x30] sm:$0xfe]  }
  0x3e   : > { %2072 = vrot.lane.b32.xlu1 %v4119_v62, %s4337_s23  ;;  %v4140_v62 = vld [vmem:[%s4374_s17 + $0x2c] ss:$0 sps:$4 sm:$0x11]   ;;  %v529_v63 = vsel %vm493_vm1, %v524_v59, %v528_v55  ;;  %v1520_v46 = vrot.slane %v1518_v40, 1  ;;  %v1420_v47 = vshrl.u32 %v4159_v43, 16  ;;  %v1422_v49 = vshll.u32 %v4159_v43, 16 }
  0x3f   : > { %2056 = vrot.lane.b32.xlu0 %v4120_v1, %s4337_s23  ;;  %v2732_v1 = vrot.slane %v4140_v62, 1  ;;  %v4161_v55 = vld [vmem:[%s4374_s17 + $0x90] sm:$0xff]   ;;  %v4162_v59 = vld [vmem:[%s4374_s17 + $0x98] ss:$0 sps:$4 sm:$0x11]   ;;  %v1837_v34 = vrot.slane %v4171_v30, 1 }
  0x40   : > { %v1424_v54 = vrot.slane %v1422_v49, 1  ;;  %v1528_v60 = vshrl.u32 %v4161_v55, 16  ;;  %v1530_v62 = vshll.u32 %v4161_v55, 16  ;;  %v4164_v2 = vld [vmem:[%s4374_s17 + $0x38] ss:$0 sps:$4 sm:$0x11]  }
  0x41   : > { %v2733_v8 = vsel %vm927_vm0, %v2731_v0, %v2732_v1  ;;  %v1535_v1 = vshll.u32 %v4162_v59, 16  ;;  %v4165_v12 = vld [vmem:[%s4374_s17 + $0x84] sm:$0xfe]   ;;  %v4166_v13 = vld [vmem:[%s4374_s17 + $0x8c] ss:$0 sps:$4 sm:$0x11]  }
  0x42   : > { %2503 = vrot.lane.b32.xlu1 %v2402_v21, %s4338_s24  ;;  %v958_v21 = vrot.slane %v4145_v16, 1  ;;  %v1425_v61 = vor.u32 %v1424_v54, %v1420_v47  ;;  %v1532_v3 = vrot.slane %v1530_v62, 1  ;;  %v1858_v16 = vrot.slane %v4165_v12, 1  ;;  %v4167_v17 = vld [vmem:[%s4374_s17 + $0x24] sm:$0xfe]   ;;  %v4173_v40 = vld [vmem:[%s4374_s17 + $0x90] sm:$0xff]  }
  0x43   : > { %2487 = vrot.lane.b32.xlu0 %v2306_v26, %s4338_s24  ;;  %v934_v26 = vrot.slane %v4147_v23, 1  ;;  %v1537_v7 = vrot.slane %v1535_v1, 1  ;;  %v4168_v20 = vld [vmem:[%s4374_s17 + $0x2c] ss:$0 sps:$4 sm:$0x11]   ;;  %v4177_v23 = vld [vmem:[%s4374_s17 + $0x90] sm:$0xff]  }
  0x44   : > { %v960_v28 = vsel %vm927_vm0, %v958_v21, %v959_v22  ;;  %v1533_v10 = vor.u32 %v1532_v3, %v1528_v60  ;;  %v1834_v22 = vrot.slane %v4167_v17, 1  ;;  %v1835_v24 = vrot.slane %v4168_v20, 1  ;;  %v4174_v43 = vld [vmem:[%s4374_s17 + $0x30] sm:$0xff]   ;;  %v4180_v47 = vld [vmem:[%s4374_s17 + $0x38] ss:$0 sps:$4 sm:$0x11]  }
  0x45   : > { %v936_v32 = vsel %vm927_vm0, %v934_v26, %v935_v29  ;;  %v4170_v26 = vld [vmem:[%s4374_s17 + $0x98] ss:$0 sps:$4 sm:$0x11]   ;;  %v2416_v33 = vshrl.u32 %v4177_v23, 16  ;;  %v2418_v35 = vshll.u32 %v4177_v23, 16  ;;  %v4181_v49 = vld [vmem:[%s4374_s17 + $0x9c] sm:$0xff]  }
  0x46   : > { %2505 = vrot.lane.b32.xlu1 %v2414_v36, %s4338_s24  ;;  %v4152_v36 = vld [vmem:[%s4374_s17 + $0x2c] ss:$0 sps:$4 sm:$0x11]   ;;  %v1538_v18 = vsel %vm493_vm1, %v1533_v10, %v1537_v7  ;;  %v1862_v29 = vrot.slane %v4170_v26, 1  ;;  %v1836_v31 = vsel %vm927_vm0, %v1834_v22, %v1835_v24  ;;  %v2430_v55 = vshll.u32 %v4181_v49, 16  ;;  %v4189_v3 = vld [vmem:[%s4374_s17 + $0x90] sm:$0xff]  }
  0x47   : > { %2489 = vrot.lane.b32.xlu0 %v2318_v37, %s4338_s24  ;;  %v1516_v37 = vshrl.u32 %v4157_v27, 16  ;;  %v938_v41 = vrot.slane %v4152_v36, 1  ;;  %v4182_v54 = vld [vmem:[%s4374_s17 + $0xa4] ss:$0 sps:$4 sm:$0x11]   ;;  %v2428_v59 = vshrl.u32 %v4181_v49, 16 }
  0x48   : > { %v2435_v60 = vshll.u32 %v4182_v54, 16  ;;  %v4188_v20 = vld [vmem:[%s4374_s17 + $0x38] ss:$0 sps:$4 sm:$0x11]   ;;  %v4200_v49 = vld [vmem:[%s4374_s17 + $0x60] sm:$0xff]  }
  0x49   : > { %v939_v45 = vsel %vm927_vm0, %v937_v39, %v938_v41  ;;  %v1521_v56 = vor.u32 %v1520_v46, %v1516_v37  ;;  %v4179_v37 = vld [vmem:[%s4374_s17 + $0x30] sm:$0xff]   ;;  %v2420_v41 = vrot.slane %v2418_v35, 1  ;;  %v2735_v26 = vrot.slane %v4188_v20, 1  ;;  %309 = vst.msk [vmem:[#allocation2 + $0x40] sm:$0xff] %vm300_vm2, %v4200_v49  ;;  %v4219_v49 = vld [vmem:[%s4374_s17 + $0x3c] sm:$0xff]  }
  0x4a   : > { %2792 = vrot.lane.b32.xlu1 %v2754_v44, %s4339_s25  ;;  %v4154_v44 = vld [vmem:[%s4374_s17 + $0x24] sm:$0xff]   ;;  %v4193_v35 = vld [vmem:[%s4374_s17 + $0xc] sm:$0xff]  }
  0x4b   : > { %2776 = vrot.lane.b32.xlu0 %v2730_v48, %s4339_s25  ;;  %v4158_v48 = vld [vmem:[%s4374_s17 + $0x8c] ss:$0 sps:$4 sm:$0x11]   ;;  %302 = vst.msk [vmem:[#allocation2 + $0x8] sm:$0xff] %vm300_vm2, %v4193_v35 }
  0x4c   : > { %v1523_v52 = vshll.u32 %v4158_v48, 16 }
  0x4e   : > { %706 = vrot.lane.b32.xlu1 %v625_v58, %s4334_s20  ;;  %v1525_v57 = vrot.slane %v1523_v52, 1  ;;  %v1427_v58 = vshll.u32 %v4160_v53, 16  ;;  %v2327_v53 = vshll.u32 %v4180_v47, 16  ;;  %v4199_v47 = vld [vmem:[%s4374_s17 + $0x6c] sm:$0xff]  }
  0x4f   : > { %690 = vrot.lane.b32.xlu0 %v529_v63, %s4334_s20  ;;  %v4163_v63 = vld [vmem:[%s4374_s17 + $0x30] sm:$0xff]   ;;  %310 = vst.msk [vmem:[#allocation2 + $0x48] sm:$0xff] %vm300_vm2, %v4199_v47  ;;  %v4217_v47 = vld [vmem:[%s4374_s17 + $0x9c] sm:$0xff]  }
  0x50   : > { %v1429_v0 = vrot.slane %v1427_v58, 1  ;;  %v1432_v4 = vshrl.u32 %v4163_v63, 16  ;;  %v1526_v6 = vsel %vm493_vm1, %v1521_v56, %v1525_v57  ;;  %v4183_v56 = vld [vmem:[%s4374_s17 + $0x3c] sm:$0xff]   ;;  %v2421_v57 = vor.u32 %v2420_v41, %v2416_v33  ;;  %v4192_v33 = vld [vmem:[%s4374_s17 + $0x38] ss:$0 sps:$4 sm:$0x11]  }
  0x51   : > { %v2329_v58 = vrot.slane %v2327_v53, 1  ;;  %v2332_v1 = vshrl.u32 %v4183_v56, 16  ;;  %v4194_v41 = vld [vmem:[%s4374_s17] sm:$0xff]  }
  0x52   : > { %2794 = vrot.lane.b32.xlu1 %v2757_v5, %s4339_s25  ;;  %v1434_v5 = vshll.u32 %v4163_v63, 16  ;;  %v1430_v9 = vsel %vm493_vm1, %v1425_v61, %v1429_v0  ;;  %v4184_v61 = vld [vmem:[%s4374_s17 + $0x44] ss:$0 sps:$4 sm:$0x11]   ;;  %v2432_v0 = vrot.slane %v2430_v55, 1  ;;  %301 = vst.msk [vmem:[#allocation2] sm:$0xff] %vm300_vm2, %v4194_v41 }
  0x53   : > { %2778 = vrot.lane.b32.xlu0 %v2733_v8, %s4339_s25  ;;  %v1439_v8 = vshll.u32 %v4164_v2, 16  ;;  %v2334_v2 = vshll.u32 %v4183_v56, 16  ;;  %v4197_v55 = vld [vmem:[%s4374_s17 + $0x3c] sm:$0xfe]  }
  0x54   : > { %v1436_v11 = vrot.slane %v1434_v5, 1  ;;  %v2339_v5 = vshll.u32 %v4184_v61, 16  ;;  %v2433_v12 = vor.u32 %v2432_v0, %v2428_v59  ;;  %v4198_v56 = vld [vmem:[%s4374_s17 + $0x44] ss:$0 sps:$4 sm:$0x11]  }
  0x55   : > { %v1441_v14 = vrot.slane %v1439_v8, 1  ;;  %v2336_v7 = vrot.slane %v2334_v2, 1  ;;  %v4185_v8 = vld [vmem:[%s4374_s17 + $0x90] sm:$0xfe]   ;;  %v2738_v59 = vrot.slane %v4198_v56, 1  ;;  %v1444_v56 = vshrl.u32 %v4219_v49, 16 }
  0x56   : > { %708 = vrot.lane.b32.xlu1 %v637_v19, %s4334_s20  ;;  %v1437_v15 = vor.u32 %v1436_v11, %v1432_v4  ;;  %v1859_v19 = vrot.slane %v4166_v13, 1  ;;  %v2437_v4 = vrot.slane %v2435_v60, 1  ;;  %v2341_v13 = vrot.slane %v2339_v5, 1  ;;  %v4202_v2 = vld [vmem:[%s4374_s17 + $0xa4] ss:$0 sps:$4 sm:$0x11]  }
  0x57   : > { %692 = vrot.lane.b32.xlu0 %v541_v25, %s4334_s20  ;;  %v4169_v25 = vld [vmem:[%s4374_s17 + $0x90] sm:$0xfe]   ;;  %v2758_v17 = vrot.slane %v4185_v8, 1  ;;  %v658_v5 = vshll.u32 %v4202_v2, 16 }
  0x58   : > { %v1442_v21 = vsel %vm493_vm1, %v1437_v15, %v1441_v14  ;;  %v1860_v27 = vsel %vm927_vm0, %v1858_v16, %v1859_v19  ;;  %v639_v14 = vshrl.u32 %v4189_v3, 16  ;;  %v2337_v16 = vor.u32 %v2336_v7, %v2332_v1  ;;  %v4187_v19 = vld [vmem:[%s4374_s17 + $0x30] sm:$0xfe]  }
  0x59   : > { %v2734_v23 = vrot.slane %v4187_v19, 1 }
  0x5a   : > { %996 = vrot.lane.b32.xlu1 %v960_v28, %s4333_s19  ;;  %v1861_v28 = vrot.slane %v4169_v25, 1  ;;  %v2438_v25 = vsel %vm493_vm1, %v2433_v12, %v2437_v4  ;;  %v2342_v30 = vsel %vm493_vm1, %v2337_v16, %v2341_v13  ;;  %v660_v12 = vrot.slane %v658_v5, 1 }
  0x5b   : > { %980 = vrot.lane.b32.xlu0 %v936_v32, %s4333_s19  ;;  %v4172_v32 = vld [vmem:[%s4374_s17 + $0x38] ss:$0 sps:$4 sm:$0x11]  }
  0x5c   : > { %v1838_v36 = vrot.slane %v4172_v32, 1 }
  0x5e   : > { %998 = vrot.lane.b32.xlu1 %v963_v38, %s4333_s19  ;;  %v1863_v38 = vsel %vm927_vm0, %v1861_v28, %v1862_v29  ;;  %v1839_v39 = vsel %vm927_vm0, %v1837_v34, %v1838_v36 }
  0x5f   : > { %982 = vrot.lane.b32.xlu0 %v939_v45, %s4333_s19  ;;  %v2322_v45 = vshll.u32 %v4179_v37, 16 }
  0x61   : > { %v2324_v48 = vrot.slane %v2322_v45, 1 }
  0x62   : > { %1174 = vrot.lane.b32.xlu1 %v4153_v42, %s4332_s18  ;;  %v2320_v42 = vshrl.u32 %v4179_v37, 16 }
  0x63   : > { %1158 = vrot.lane.b32.xlu0 %v4154_v44, %s4332_s18  ;;  %v4178_v44 = vld [vmem:[%s4374_s17 + $0x98] ss:$0 sps:$4 sm:$0x11]  }
  0x64   : > { %v2423_v46 = vshll.u32 %v4178_v44, 16  ;;  %v2325_v62 = vor.u32 %v2324_v48, %v2320_v42  ;;  %v2736_v42 = vsel %vm927_vm0, %v2734_v23, %v2735_v26  ;;  %v4196_v48 = vld [vmem:[%s4374_s17 + $0xa4] ss:$0 sps:$4 sm:$0x11]   ;;  %v4207_v23 = vld [vmem:[%s4374_s17 + $0x30] sm:$0xfe]  }
  0x65   : > { %v2762_v54 = vrot.slane %v4196_v48, 1  ;;  %v4218_v48 = vld [vmem:[%s4374_s17 + $0xa4] ss:$0 sps:$4 sm:$0x11]  }
  0x66   : > { %1176 = vrot.lane.b32.xlu1 %v4155_v50, %s4332_s18  ;;  %v4175_v50 = vld [vmem:[%s4374_s17 + $0x9c] sm:$0xff]   ;;  %v2425_v52 = vrot.slane %v2423_v46, 1  ;;  %v2330_v15 = vsel %vm493_vm1, %v2325_v62, %v2329_v58  ;;  %v2737_v58 = vrot.slane %v4197_v55, 1 }
  0x67   : > { %1160 = vrot.lane.b32.xlu0 %v4156_v51, %s4332_s18  ;;  %v4176_v51 = vld [vmem:[%s4374_s17 + $0x3c] sm:$0xff]  }
  0x68   : > { %v2426_v10 = vsel %vm493_vm1, %v2421_v57, %v2425_v52  ;;  %v4195_v46 = vld [vmem:[%s4374_s17 + $0x9c] sm:$0xfe]   ;;  %v2739_v1 = vsel %vm927_vm0, %v2737_v58, %v2738_v59 }
  0x69   : > { %v4201_v52 = vld [vmem:[%s4374_s17 + $0x9c] sm:$0xff]  }
  0x6a   : > { %1607 = vrot.lane.b32.xlu1 %v1526_v6, %s4335_s21  ;;  %v4191_v6 = vld [vmem:[%s4374_s17 + $0x30] sm:$0xff]   ;;  %v651_v62 = vshrl.u32 %v4201_v52, 16  ;;  %v653_v0 = vshll.u32 %v4201_v52, 16  ;;  %v1542_v52 = vshll.u32 %v4217_v47, 16 }
  0x6b   : > { %1591 = vrot.lane.b32.xlu0 %v1430_v9, %s4335_s21  ;;  %v4186_v9 = vld [vmem:[%s4374_s17 + $0x98] ss:$0 sps:$4 sm:$0x11]   ;;  %v543_v24 = vshrl.u32 %v4191_v6, 16  ;;  %v545_v29 = vshll.u32 %v4191_v6, 16 }
  0x6c   : > { %v655_v4 = vrot.slane %v653_v0, 1  ;;  %v4204_v6 = vld [vmem:[%s4374_s17 + $0x44] ss:$0 sps:$4 sm:$0x11]   ;;  %v1544_v59 = vrot.slane %v1542_v52, 1  ;;  %v4234_v52 = vld [vmem:[%s4374_s17 + $0x48] sm:$0xff]  }
  0x6d   : > { %v547_v34 = vrot.slane %v545_v29, 1 }
  0x6e   : > { %1609 = vrot.lane.b32.xlu1 %v1538_v18, %s4335_s21  ;;  %v2759_v18 = vrot.slane %v4186_v9, 1  ;;  %v656_v9 = vor.u32 %v655_v4, %v651_v62  ;;  %v4221_v62 = vld [vmem:[%s4374_s17 + $0xa8] sm:$0xff]  }
  0x6f   : > { %1593 = vrot.lane.b32.xlu0 %v1442_v21, %s4335_s21  ;;  %v641_v21 = vshll.u32 %v4189_v3, 16  ;;  %v4203_v3 = vld [vmem:[%s4374_s17 + $0x3c] sm:$0xff]   ;;  %v1552_v4 = vshrl.u32 %v4221_v62, 16  ;;  %v1554_v5 = vshll.u32 %v4221_v62, 16 }
  0x70   : > { %v2760_v36 = vsel %vm927_vm0, %v2758_v17, %v2759_v18  ;;  %v555_v7 = vshrl.u32 %v4203_v3, 16  ;;  %v557_v8 = vshll.u32 %v4203_v3, 16  ;;  %v4206_v17 = vld [vmem:[%s4374_s17 + $0x98] ss:$0 sps:$4 sm:$0x11]  }
  0x71   : > { %v643_v28 = vrot.slane %v641_v21, 1  ;;  %v965_v21 = vrot.slane %v4206_v17, 1 }
  0x72   : > { %1896 = vrot.lane.b32.xlu1 %v1860_v27, %s4336_s22  ;;  %v4190_v27 = vld [vmem:[%s4374_s17 + $0x98] ss:$0 sps:$4 sm:$0x11]   ;;  %v559_v13 = vrot.slane %v557_v8, 1 }
  0x73   : > { %1880 = vrot.lane.b32.xlu0 %v1836_v31, %s4336_s22  ;;  %v646_v32 = vshll.u32 %v4190_v27, 16 }
  0x74   : > { %v560_v18 = vor.u32 %v559_v13, %v555_v7 }
  0x76   : > { %1898 = vrot.lane.b32.xlu1 %v1863_v38, %s4336_s22  ;;  %v644_v38 = vor.u32 %v643_v28, %v639_v14  ;;  %v562_v14 = vshll.u32 %v4204_v6, 16  ;;  %v940_v28 = vrot.slane %v4207_v23, 1  ;;  %v4223_v6 = vld [vmem:[%s4374_s17 + $0x48] sm:$0xff]   ;;  %v4226_v23 = vld [vmem:[%s4374_s17 + $0xa4] ss:$0 sps:$4 sm:$0x11]  }
  0x77   : > { %1882 = vrot.lane.b32.xlu0 %v1839_v39, %s4336_s22  ;;  %v648_v39 = vrot.slane %v646_v32, 1 }
  0x78   : > { %v564_v19 = vrot.slane %v562_v14, 1  ;;  %v1556_v14 = vrot.slane %v1554_v5, 1 }
  0x7a   : > { %2074 = vrot.lane.b32.xlu1 %v4173_v40, %s4337_s23  ;;  %v550_v40 = vshll.u32 %v4192_v33, 16  ;;  %v4211_v33 = vld [vmem:[%s4374_s17 + $0x3c] sm:$0xfe]  }
  0x7b   : > { %2058 = vrot.lane.b32.xlu0 %v4174_v43, %s4337_s23  ;;  %v548_v43 = vor.u32 %v547_v34, %v543_v24  ;;  %v4208_v24 = vld [vmem:[%s4374_s17 + $0x38] ss:$0 sps:$4 sm:$0x11]  }
  0x7c   : > { %v552_v45 = vrot.slane %v550_v40, 1  ;;  %v941_v29 = vrot.slane %v4208_v24, 1 }
  0x7e   : > { %2076 = vrot.lane.b32.xlu1 %v4175_v50, %s4337_s23  ;;  %v649_v50 = vsel %vm493_vm1, %v644_v38, %v648_v39  ;;  %v553_v53 = vsel %vm493_vm1, %v548_v43, %v552_v45  ;;  %v943_v38 = vrot.slane %v4211_v33, 1  ;;  %v4213_v39 = vld [vmem:[%s4374_s17 + $0x9c] sm:$0xff]  }
  0x7f   : > { %2060 = vrot.lane.b32.xlu0 %v4176_v51, %s4337_s23  ;;  %v2761_v51 = vrot.slane %v4195_v46, 1  ;;  %v4215_v46 = vld [vmem:[%s4374_s17 + $0xa8] sm:$0xff]  }
  0x81   : > { %v2763_v61 = vsel %vm927_vm0, %v2761_v51, %v2762_v54  ;;  %v1540_v51 = vshrl.u32 %v4217_v47, 16  ;;  %v4220_v54 = vld [vmem:[%s4374_s17 + $0x44] ss:$0 sps:$4 sm:$0x11]  }
  0x82   : > { %2507 = vrot.lane.b32.xlu1 %v2426_v10, %s4338_s24 }
  0x83   : > { %2491 = vrot.lane.b32.xlu0 %v2330_v15, %s4338_s24  ;;  %v4205_v15 = vld [vmem:[%s4374_s17 + $0x90] sm:$0xfe]   ;;  %v1545_v2 = vor.u32 %v1544_v59, %v1540_v51  ;;  %v4241_v59 = vld [vmem:[%s4374_s17 + $0xb0] ss:$0 sps:$4 sm:$0x11]  }
  0x84   : > { %v4574_v63 = vpop.permute.xlu1 %1170  ;;  %v964_v20 = vrot.slane %v4205_v15, 1  ;;  %v1456_v15 = vshrl.u32 %v4223_v6, 16 }
  0x85   : > { %v4583_v11 = vpop.permute.xlu0 %1154 }
  0x86   : > { %2509 = vrot.lane.b32.xlu1 %v2438_v25, %s4338_s24  ;;  %v565_v25 = vsel %vm493_vm1, %v560_v18, %v564_v19  ;;  %v1557_v19 = vor.u32 %v1556_v14, %v1552_v4 }
  0x87   : > { %2493 = vrot.lane.b32.xlu0 %v2342_v30, %s4338_s24  ;;  %v4209_v30 = vld [vmem:[%s4374_s17 + $0x9c] sm:$0xfe]  }
  0x88   : > { %v4589_v22 = vpop.permute.xlu1 %992  ;;  %v967_v32 = vrot.slane %v4209_v30, 1  ;;  %v4227_v30 = vld [vmem:[%s4374_s17 + $0x3c] sm:$0xfe]  }
  0x89   : > { %v977_v31 = vpop.permute.xlu0 %976 }
  0x8a   : > { %2796 = vrot.lane.b32.xlu1 %v2760_v36, %s4339_s25  ;;  %v4212_v36 = vld [vmem:[%s4374_s17 + $0x44] ss:$0 sps:$4 sm:$0x11]  }
  0x8b   : > { %2780 = vrot.lane.b32.xlu0 %v2736_v42, %s4339_s25  ;;  %v944_v41 = vrot.slane %v4212_v36, 1  ;;  %v4214_v42 = vld [vmem:[%s4374_s17 + $0x3c] sm:$0xff]   ;;  %v4229_v36 = vld [vmem:[%s4374_s17 + $0xa8] sm:$0xfe]  }
  0x8c   : > { %v995_v37 = vpop.permute.xlu1 %994 }
  0x8d   : > { %v979_v44 = vpop.permute.xlu0 %978  ;;  %v945_v43 = vsel %vm927_vm0, %v943_v38, %v944_v41 }
  0x8e   : > { %710 = vrot.lane.b32.xlu1 %v649_v50, %s4334_s20  ;;  %v4216_v50 = vld [vmem:[%s4374_s17 + $0x48] sm:$0xff]  }
  0x8f   : > { %694 = vrot.lane.b32.xlu0 %v553_v53, %s4334_s20  ;;  %v1547_v53 = vshll.u32 %v4218_v48, 16 }
  0x90   : > { %v689_v57 = vpop.permute.xlu1 %688 }
  0x91   : > { %736 = vst.msk [vmem:[#allocation2 + $0x8] sm:$0xff] %vm734_vm3, %v689_v57  ;;  %v687_v60 = vpop.permute.xlu0 %686  ;;  %v1446_v57 = vshll.u32 %v4219_v49, 16  ;;  %v4233_v49 = vld [vmem:[%s4374_s17 + $0xa8] sm:$0xff]  }
  0x92   : > { %1026 = vst.msk [vmem:[#allocation2 + $0x8] sm:$0xff] %vm1024_vm4, %v979_v44  ;;  %2798 = vrot.lane.b32.xlu1 %v2763_v61, %s4339_s25  ;;  %v1451_v61 = vshll.u32 %v4220_v54, 16  ;;  %v4238_v54 = vld [vmem:[%s4374_s17 + $0x18] sm:$0xff]  }
  0x93   : > { %735 = vst.msk [vmem:[#allocation2] sm:$0xff] %vm734_vm3, %v687_v60  ;;  %2782 = vrot.lane.b32.xlu0 %v2739_v1, %s4339_s25  ;;  %v1549_v60 = vrot.slane %v1547_v53, 1  ;;  %v1448_v0 = vrot.slane %v1446_v57, 1  ;;  %v4222_v1 = vld [vmem:[%s4374_s17 + $0xb0] ss:$0 sps:$4 sm:$0x11]  }
  0x94   : > { %1025 = vst.msk [vmem:[#allocation2] sm:$0xff] %vm1024_vm4, %v977_v31  ;;  %v705_v10 = vpop.permute.xlu1 %704  ;;  %v4210_v31 = vld [vmem:[%s4374_s17 + $0xa4] ss:$0 sps:$4 sm:$0x11]   ;;  %v1453_v3 = vrot.slane %v1451_v61, 1  ;;  %v4235_v57 = vld [vmem:[%s4374_s17 + $0xb4] sm:$0xff]  }
  0x95   : > { %1203 = vst.msk [vmem:[#allocation2] sm:$0xff] %vm1202_vm5, %v4583_v11  ;;  %v703_v16 = vpop.permute.xlu0 %702  ;;  %v661_v11 = vsel %vm493_vm1, %v656_v9, %v660_v12  ;;  %v968_v35 = vrot.slane %v4210_v31, 1  ;;  %v1449_v8 = vor.u32 %v1448_v0, %v1444_v56  ;;  %v1559_v9 = vshll.u32 %v4222_v1, 16  ;;  %v4228_v31 = vld [vmem:[%s4374_s17 + $0x44] ss:$0 sps:$4 sm:$0x11]  }
  0x96   : > { %744 = vst.msk [vmem:[#allocation2 + $0x48] sm:$0xff] %vm734_vm3, %v705_v10  ;;  %743 = vst.msk [vmem:[#allocation2 + $0x40] sm:$0xff] %vm734_vm3, %v703_v16  ;;  %712 = vrot.lane.b32.xlu1 %v661_v11, %s4334_s20  ;;  %v4224_v10 = vld [vmem:[%s4374_s17 + $0x50] ss:$0 sps:$4 sm:$0x11]   ;;  %v1550_v13 = vsel %vm493_vm1, %v1545_v2, %v1549_v60  ;;  %v1458_v16 = vshll.u32 %v4223_v6, 16 }
  0x97   : > { %1034 = vst.msk [vmem:[#allocation2 + $0x48] sm:$0xff] %vm1024_vm4, %v995_v37  ;;  %1033 = vst.msk [vmem:[#allocation2 + $0x40] sm:$0xff] %vm1024_vm4, %v4589_v22  ;;  %696 = vrot.lane.b32.xlu0 %v565_v25, %s4334_s20  ;;  %v966_v22 = vsel %vm927_vm0, %v964_v20, %v965_v21  ;;  %v969_v40 = vsel %vm927_vm0, %v967_v32, %v968_v35  ;;  %v1454_v17 = vsel %vm493_vm1, %v1449_v8, %v1453_v3  ;;  %v4225_v21 = vld [vmem:[%s4374_s17 + $0x9c] sm:$0xfe]   ;;  %v4242_v60 = vld [vmem:[%s4374_s17 + $0x48] sm:$0xff]  }
  0x98   : > { %v1173_v26 = vpop.permute.xlu1 %1172  ;;  %1211 = vst.msk [vmem:[#allocation2 + $0x40] sm:$0xff] %vm1202_vm5, %v4574_v63  ;;  %v942_v63 = vsel %vm927_vm0, %v940_v28, %v941_v29  ;;  %v1561_v11 = vrot.slane %v1559_v9, 1  ;;  %v1463_v18 = vshll.u32 %v4224_v10, 16  ;;  %v1460_v20 = vrot.slane %v1458_v16, 1  ;;  %v4236_v61 = vld [vmem:[%s4374_s17 + $0x54] sm:$0xff]   ;;  %v4244_v8 = vld [vmem:[%s5084_s1 + $0x8] sm:$0xff]  }
  0x99   : > { %1212 = vst.msk [vmem:[#allocation2 + $0x48] sm:$0xff] %vm1202_vm5, %v1173_v26  ;;  %v1157_v27 = vpop.permute.xlu0 %1156  ;;  %v1864_v28 = vrot.slane %v4225_v21, 1  ;;  %v1865_v29 = vrot.slane %v4226_v23, 1  ;;  %v1840_v32 = vrot.slane %v4227_v30, 1  ;;  %v1841_v35 = vrot.slane %v4228_v31, 1  ;;  %v4247_v16 = vld [vmem:[%s4374_s17 + $0x54] sm:$0xff]  }
  0x9a   : > { %1204 = vst.msk [vmem:[#allocation2 + $0x8] sm:$0xff] %vm1202_vm5, %v1157_v27  ;;  %1000 = vrot.lane.b32.xlu1 %v966_v22, %s4333_s19  ;;  %v1465_v25 = vrot.slane %v1463_v18, 1  ;;  %v1562_v27 = vsel %vm493_vm1, %v1557_v19, %v1561_v11  ;;  %v1461_v22 = vor.u32 %v1460_v20, %v1456_v15  ;;  %v2447_v2 = vshll.u32 %v4241_v59, 16  ;;  %v4243_v3 = vld [vmem:[%s4374_s17 + $0x50] ss:$0 sps:$4 sm:$0x11]  }
  0x9b   : > { %984 = vrot.lane.b32.xlu0 %v942_v63, %s4333_s19  ;;  %303 = vst.msk [vmem:[#allocation2 + $0x10] sm:$0xff] %vm300_vm2, %v4238_v54  ;;  %v2344_v4 = vshrl.u32 %v4242_v60, 16  ;;  %v2346_v5 = vshll.u32 %v4242_v60, 16  ;;  %v4246_v15 = vld [vmem:[%s4374_s17 + $0xbc] ss:$0 sps:$4 sm:$0x11]  }
  0x9c   : > { %v1604_v34 = vpop.permute.xlu1 %1603  ;;  %v1466_v63 = vsel %vm493_vm1, %v1461_v22, %v1465_v25  ;;  %v2449_v9 = vrot.slane %v2447_v2, 1  ;;  %v4249_v21 = vld [vmem:[%s4374_s17 + $0x84] sm:$0xff]   ;;  %v2459_v25 = vshll.u32 %v4246_v15, 16 }
  0x9d   : > { %1644 = vst.msk [vmem:[#allocation2 + $0x40] sm:$0xff] %vm1635_vm6, %v1604_v34  ;;  %v1588_v37 = vpop.permute.xlu0 %1587  ;;  %v1866_v34 = vsel %vm927_vm0, %v1864_v28, %v1865_v29  ;;  %v2348_v10 = vrot.slane %v2346_v5, 1  ;;  %v2356_v28 = vshrl.u32 %v4247_v16, 16  ;;  %v2358_v29 = vshll.u32 %v4247_v16, 16  ;;  %v4250_v30 = vld [vmem:[%s4374_s17 + $0x24] sm:$0xff]   ;;  %v4264_v5 = vld [vmem:[%s4374_s17 + $0xb4] sm:$0xff]  }
  0x9e   : > { %1636 = vst.msk [vmem:[#allocation2] sm:$0xff] %vm1635_vm6, %v1588_v37  ;;  %1002 = vrot.lane.b32.xlu1 %v969_v40, %s4333_s19  ;;  %v4230_v37 = vld [vmem:[%s4374_s17 + $0xb0] ss:$0 sps:$4 sm:$0x11]   ;;  %v1867_v40 = vrot.slane %v4229_v36, 1  ;;  %v2461_v31 = vrot.slane %v2459_v25, 1 }
  0x9f   : > { %986 = vrot.lane.b32.xlu0 %v945_v43, %s4333_s19  ;;  %v1868_v41 = vrot.slane %v4230_v37, 1  ;;  %v4232_v43 = vld [vmem:[%s4374_s17 + $0x50] ss:$0 sps:$4 sm:$0x11]   ;;  %v2349_v11 = vor.u32 %v2348_v10, %v2344_v4  ;;  %312 = vst.msk [vmem:[#allocation2 + $0x58] sm:$0xff] %vm300_vm2, %v4249_v21  ;;  %304 = vst.msk [vmem:[#allocation2 + $0x18] sm:$0xff] %vm300_vm2, %v4250_v30 }
  0xa0   : > { %v1606_v44 = vpop.permute.xlu1 %1605  ;;  %v1844_v48 = vrot.slane %v4232_v43, 1  ;;  %v4252_v43 = vld [vmem:[%s4374_s17 + $0xa8] sm:$0xfe]   ;;  %v4259_v4 = vld [vmem:[%s4374_s17 + $0x50] ss:$0 sps:$4 sm:$0x11]  }
  0xa1   : > { %1645 = vst.msk [vmem:[#allocation2 + $0x48] sm:$0xff] %vm1635_vm6, %v1606_v44  ;;  %v1590_v45 = vpop.permute.xlu0 %1589  ;;  %v574_v10 = vshll.u32 %v4259_v4, 16  ;;  %v4263_v25 = vld [vmem:[%s4374_s17 + $0x5c] ss:$0 sps:$4 sm:$0x11]  }
  0xa2   : > { %1637 = vst.msk [vmem:[#allocation2 + $0x8] sm:$0xff] %vm1635_vm6, %v1590_v45  ;;  %1178 = vrot.lane.b32.xlu1 %v4213_v39, %s4332_s18  ;;  %v1842_v39 = vsel %vm927_vm0, %v1840_v32, %v1841_v35  ;;  %v1869_v45 = vsel %vm927_vm0, %v1867_v40, %v1868_v41  ;;  %v2360_v35 = vrot.slane %v2358_v29, 1  ;;  %v4256_v40 = vld [vmem:[%s4374_s17 + $0xa8] sm:$0xff]   ;;  %v2744_v29 = vrot.slane %v4263_v25, 1  ;;  %v4279_v25 = vld [vmem:[%s4374_s17 + $0x60] sm:$0xff]  }
  0xa3   : > { %1162 = vrot.lane.b32.xlu0 %v4214_v42, %s4332_s18  ;;  %v4231_v42 = vld [vmem:[%s4374_s17 + $0x48] sm:$0xfe]  }
  0xa4   : > { %v1893_v55 = vpop.permute.xlu1 %1892 }
  0xa5   : > { %1933 = vst.msk [vmem:[#allocation2 + $0x40] sm:$0xff] %vm1924_vm7, %v1893_v55  ;;  %v1877_v58 = vpop.permute.xlu0 %1876  ;;  %v4239_v55 = vld [vmem:[%s5084_s1] sm:$0xff]  }
  0xa6   : > { %1925 = vst.msk [vmem:[#allocation2] sm:$0xff] %vm1924_vm7, %v1877_v58  ;;  %1180 = vrot.lane.b32.xlu1 %v4215_v46, %s4332_s18  ;;  %v1843_v46 = vrot.slane %v4231_v42, 1  ;;  %v4240_v58 = vld [vmem:[%s4374_s17 + $0xa8] sm:$0xff]   ;;  %4018 = vmatprep.subr.bf16.mxu0 %v4239_v55  ;;  %v2361_v42 = vor.u32 %v2360_v35, %v2356_v28  ;;  %v4267_v35 = vld [vmem:[%s4374_s17 + $0x5c] ss:$0 sps:$4 sm:$0x11]  }
  0xa7   : > { %1164 = vrot.lane.b32.xlu0 %v4216_v50, %s4332_s18  ;;  %v4237_v50 = vld [vmem:[%s4374_s17 + $0x78] sm:$0xff]   ;;  %4056 = vmatprep.subr.bf16.mxu1 %v4239_v55  ;;  %v2440_v62 = vshrl.u32 %v4240_v58, 16  ;;  %v2442_v0 = vshll.u32 %v4240_v58, 16  ;;  %v665_v58 = vshll.u32 %v4256_v40, 16 }
  0xa8   : > { %v1895_v7 = vpop.permute.xlu1 %1894  ;;  %v1845_v51 = vsel %vm927_vm0, %v1843_v46, %v1844_v48  ;;  %311 = vst.msk [vmem:[#allocation2 + $0x50] sm:$0xff] %vm300_vm2, %v4237_v50  ;;  %4019 = vmatpush3.bf16.msra.mxu0 %v4239_v55  ;;  %4059 = vmatpush3.bf16.msra.mxu1 %v4239_v55  ;;  %v2764_v48 = vrot.slane %v4252_v43, 1 }
  0xa9   : > { %1934 = vst.msk [vmem:[#allocation2 + $0x48] sm:$0xff] %vm1924_vm7, %v1895_v7  ;;  %v1879_v12 = vpop.permute.xlu0 %1878  ;;  %v2444_v7 = vrot.slane %v2442_v0, 1  ;;  %4020 = vmatprep.subr.bf16.mxu0 %v4244_v8  ;;  %4057 = vmatprep.subr.bf16.mxu1 %v4244_v8 }
  0xaa   : > { %1926 = vst.msk [vmem:[#allocation2 + $0x8] sm:$0xff] %vm1924_vm7, %v1879_v12  ;;  %1611 = vrot.lane.b32.xlu1 %v1550_v13, %s4335_s21  ;;  %v2351_v12 = vshll.u32 %v4243_v3, 16  ;;  %v4245_v13 = vld [vmem:[%s4374_s17 + $0xb4] sm:$0xff]   ;;  %v4258_v3 = vld [vmem:[%s4374_s17 + $0x48] sm:$0xff]  }
  0xab   : > { %1595 = vrot.lane.b32.xlu0 %v1454_v17, %s4335_s21  ;;  %v2445_v14 = vor.u32 %v2444_v7, %v2440_v62  ;;  %v2452_v19 = vshrl.u32 %v4245_v13, 16  ;;  %v2454_v20 = vshll.u32 %v4245_v13, 16  ;;  %v4260_v13 = vld [vmem:[%s4374_s17 + $0xb4] sm:$0xfe]  }
  0xac   : > { %v2071_v24 = vpop.permute.xlu1 %2070  ;;  %v2353_v18 = vrot.slane %v2351_v12, 1  ;;  %4021 = vmatpush3.bf16.msra.mxu0 %v4244_v8  ;;  %4060 = vmatpush3.bf16.msra.mxu1 %v4244_v8  ;;  %v567_v8 = vshrl.u32 %v4258_v3, 16 }
  0xad   : > { %2111 = vst.msk [vmem:[#allocation2 + $0x40] sm:$0xff] %vm2102_vm8, %v2071_v24  ;;  %v2055_v26 = vpop.permute.xlu0 %2054  ;;  %v2450_v24 = vsel %vm493_vm1, %v2445_v14, %v2449_v9  ;;  %v2456_v22 = vrot.slane %v2454_v20, 1  ;;  %v569_v9 = vshll.u32 %v4258_v3, 16  ;;  %v675_v14 = vshrl.u32 %v4264_v5, 16  ;;  %v4266_v20 = vld [vmem:[%s4374_s17 + $0x54] sm:$0xff]  }
  0xae   : > { %2103 = vst.msk [vmem:[#allocation2] sm:$0xff] %vm2102_vm8, %v2055_v26  ;;  %1613 = vrot.lane.b32.xlu1 %v1562_v27, %s4335_s21  ;;  %v4248_v26 = vld [vmem:[%s4374_s17 + $0x5c] ss:$0 sps:$4 sm:$0x11]   ;;  %v2354_v27 = vsel %vm493_vm1, %v2349_v11, %v2353_v18  ;;  %v576_v18 = vrot.slane %v574_v10, 1 }
  0xaf   : > { %1597 = vrot.lane.b32.xlu0 %v1466_v63, %s4335_s21  ;;  %v2363_v63 = vshll.u32 %v4248_v26, 16  ;;  %v571_v16 = vrot.slane %v569_v9, 1  ;;  %v4261_v11 = vld [vmem:[%s4374_s17 + $0xbc] ss:$0 sps:$4 sm:$0x11]   ;;  %v4280_v9 = vld [vmem:[%s4374_s17 + $0xb4] sm:$0xff]  }
  0xb0   : > { %v2073_v33 = vpop.permute.xlu1 %2072  ;;  %v4275_v3 = vld [vmem:[%s4374_s17 + $0x5c] ss:$0 sps:$4 sm:$0x11]  }
  0xb1   : > { %2112 = vst.msk [vmem:[#allocation2 + $0x48] sm:$0xff] %vm2102_vm8, %v2073_v33  ;;  %v2057_v38 = vpop.permute.xlu0 %2056  ;;  %v572_v21 = vor.u32 %v571_v16, %v567_v8  ;;  %v4276_v8 = vld [vmem:[%s4374_s17 + $0xb4] sm:$0xff]   ;;  %v1564_v16 = vshrl.u32 %v4280_v9, 16 }
  0xb2   : > { %2104 = vst.msk [vmem:[#allocation2 + $0x8] sm:$0xff] %vm2102_vm8, %v2057_v38  ;;  %1900 = vrot.lane.b32.xlu1 %v1866_v34, %s4336_s22  ;;  %v2457_v34 = vor.u32 %v2456_v22, %v2452_v19  ;;  %v2365_v38 = vrot.slane %v2363_v63, 1  ;;  %v2767_v19 = vrot.slane %v4260_v13, 1  ;;  %v677_v63 = vshll.u32 %v4264_v5, 16  ;;  %v4277_v13 = vld [vmem:[%s4374_s17 + $0x54] sm:$0xff]  }
  0xb3   : > { %1884 = vrot.lane.b32.xlu0 %v1842_v39, %s4336_s22  ;;  %v4251_v39 = vld [vmem:[%s5084_s1 + $0x10] ss:$0 sps:$4 sm:$0x33]  }
  0xb4   : > { %v2504_v44 = vpop.permute.xlu1 %2503  ;;  %v2462_v41 = vsel %vm493_vm1, %v2457_v34, %v2461_v31  ;;  %4062 = vmatprep.subr.msk.bf16.mxu0 %vm2933_vm12, %v4251_v39  ;;  %v2366_v46 = vsel %vm493_vm1, %v2361_v42, %v2365_v38  ;;  %4063 = vmatprep.subr.msk.bf16.mxu1 %vm2933_vm12, %v4251_v39  ;;  %v4265_v31 = vld [vmem:[%s4374_s17 + $0xbc] ss:$0 sps:$4 sm:$0x11]   ;;  %v4268_v42 = vld [vmem:[%s4374_s17 + $0xa8] sm:$0xfe]  }
  0xb5   : > { %2544 = vst.msk [vmem:[#allocation2 + $0x40] sm:$0xff] %vm2535_vm9, %v2504_v44  ;;  %v2488_v47 = vpop.permute.xlu0 %2487  ;;  %v2935_v44 = vsel %vm2933_vm12, %v4251_v39, 0  ;;  %v682_v34 = vshll.u32 %v4265_v31, 16 }
  0xb6   : > { %2536 = vst.msk [vmem:[#allocation2] sm:$0xff] %vm2535_vm9, %v2488_v47  ;;  %1902 = vrot.lane.b32.xlu1 %v1869_v45, %s4336_s22  ;;  %v4253_v45 = vld [vmem:[%s4374_s17 + $0xb0] ss:$0 sps:$4 sm:$0x11]   ;;  %4023 = vmatpush3.bf16.msra.mxu0 %v2935_v44 }
  0xb7   : > { %1886 = vrot.lane.b32.xlu0 %v1845_v51, %s4336_s22  ;;  %4061 = vmatpush3.bf16.msra.mxu1 %v2935_v44  ;;  %v2765_v51 = vrot.slane %v4253_v45, 1  ;;  %v684_v39 = vrot.slane %v682_v34, 1  ;;  %v4269_v45 = vld [vmem:[%s4374_s17 + $0xb0] ss:$0 sps:$4 sm:$0x11]  }
  0xb8   : > { %v2506_v53 = vpop.permute.xlu1 %2505 }
  0xb9   : > { %2545 = vst.msk [vmem:[#allocation2 + $0x48] sm:$0xff] %vm2535_vm9, %v2506_v53  ;;  %v2490_v56 = vpop.permute.xlu0 %2489  ;;  %v4255_v53 = vld [vmem:[%s4374_s17 + $0x50] ss:$0 sps:$4 sm:$0x11]   ;;  %v2766_v54 = vsel %vm927_vm0, %v2764_v48, %v2765_v51  ;;  %v4270_v51 = vld [vmem:[%s4374_s17 + $0x48] sm:$0xfe]  }
  0xba   : > { %2537 = vst.msk [vmem:[#allocation2 + $0x8] sm:$0xff] %vm2535_vm9, %v2490_v56  ;;  %2078 = vrot.lane.b32.xlu1 %v4233_v49, %s4337_s23  ;;  %v663_v49 = vshrl.u32 %v4256_v40, 16  ;;  %v2741_v56 = vrot.slane %v4255_v53, 1  ;;  %v586_v40 = vshll.u32 %v4267_v35, 16 }
  0xbb   : > { %2062 = vrot.lane.b32.xlu0 %v4234_v52, %s4337_s23  ;;  %v4254_v52 = vld [vmem:[%s4374_s17 + $0x48] sm:$0xfe]  }
  0xbc   : > { %v2793_v1 = vpop.permute.xlu1 %2792  ;;  %v2740_v55 = vrot.slane %v4254_v52, 1  ;;  %v4271_v52 = vld [vmem:[%s4374_s17 + $0x50] ss:$0 sps:$4 sm:$0x11]  }
  0xbd   : > { %2833 = vst.msk [vmem:[#allocation2 + $0x40] sm:$0xff] %vm2824_vm10, %v2793_v1  ;;  %v2777_v6 = vpop.permute.xlu0 %2776  ;;  %v667_v1 = vrot.slane %v665_v58, 1  ;;  %v947_v58 = vrot.slane %v4271_v52, 1  ;;  %v4289_v52 = vld [vmem:[%s4374_s17 + $0xbc] ss:$0 sps:$4 sm:$0x11]  }
  0xbe   : > { %2825 = vst.msk [vmem:[#allocation2] sm:$0xff] %vm2824_vm10, %v2777_v6  ;;  %2080 = vrot.lane.b32.xlu1 %v4235_v57, %s4337_s23  ;;  %v4257_v57 = vld [vmem:[%s4374_s17 + $0xb0] ss:$0 sps:$4 sm:$0x11]  }
  0xbf   : > { %2064 = vrot.lane.b32.xlu0 %v4236_v61, %s4337_s23  ;;  %v2742_v61 = vsel %vm927_vm0, %v2740_v55, %v2741_v56  ;;  %v670_v2 = vshll.u32 %v4257_v57, 16  ;;  %v668_v6 = vor.u32 %v667_v1, %v663_v49  ;;  %v946_v57 = vrot.slane %v4270_v51, 1 }
  0xc0   : > { %v707_v17 = vpop.permute.xlu1 %706 }
  0xc1   : > { %745 = vst.msk [vmem:[#allocation2 + $0x50] sm:$0xff] %vm734_vm3, %v707_v17  ;;  %v691_v23 = vpop.permute.xlu0 %690  ;;  %v672_v7 = vrot.slane %v670_v2, 1 }
  0xc2   : > { %737 = vst.msk [vmem:[#allocation2 + $0x10] sm:$0xff] %vm734_vm3, %v691_v23  ;;  %2511 = vrot.lane.b32.xlu1 %v2450_v24, %s4338_s24  ;;  %v2768_v23 = vrot.slane %v4261_v11, 1  ;;  %v4262_v24 = vld [vmem:[%s4374_s17 + $0x54] sm:$0xfe]  }
  0xc3   : > { %2495 = vrot.lane.b32.xlu0 %v2354_v27, %s4338_s24  ;;  %v673_v15 = vsel %vm493_vm1, %v668_v6, %v672_v7  ;;  %v577_v27 = vsel %vm493_vm1, %v572_v21, %v576_v18  ;;  %v2743_v28 = vrot.slane %v4262_v24, 1  ;;  %v950_v7 = vrot.slane %v4275_v3, 1  ;;  %v4282_v11 = vld [vmem:[%s4374_s17 + $0x54] sm:$0xff]   ;;  %v4278_v18 = vld [vmem:[%s4374_s17 + $0xc0] sm:$0xff]  }
  0xc4   : > { %v2795_v32 = vpop.permute.xlu1 %2794  ;;  %v2849_v33 = vld [vmem:[#allocation2 + $0x40] sm:$0xff]  ;;  %v2769_v22 = vsel %vm927_vm0, %v2767_v19, %v2768_v23  ;;  %v4283_v23 = vld [vmem:[%s4374_s17 + $0x5c] ss:$0 sps:$4 sm:$0x11]   ;;  %v1468_v24 = vshrl.u32 %v4282_v11, 16 }
  0xc5   : > { %2834 = vst.msk [vmem:[#allocation2 + $0x48] sm:$0xff] %vm2824_vm10, %v2795_v32  ;;  %v2779_v36 = vpop.permute.xlu0 %2778  ;;  %v2841_v37 = vld [vmem:[#allocation2] sm:$0xff]  ;;  %4040 = vmatprep.mubr.msk.bf16.mxu1 %vm2884_vm11, %v2849_v33  ;;  %v579_v32 = vshrl.u32 %v4266_v20, 16  ;;  %v2745_v33 = vsel %vm927_vm0, %v2743_v28, %v2744_v29 }
  0xc6   : > { %2826 = vst.msk [vmem:[#allocation2 + $0x8] sm:$0xff] %vm2824_vm10, %v2779_v36  ;;  %4024 = vmatprep.mubr.msk.bf16.mxu0 %vm2884_vm11, %v2841_v37  ;;  %2513 = vrot.lane.b32.xlu1 %v2462_v41, %s4338_s24  ;;  %v679_v36 = vrot.slane %v677_v63, 1  ;;  %v581_v37 = vshll.u32 %v4266_v20, 16  ;;  %v4285_v63 = vld [vmem:[%s4374_s17 + $0xc8] ss:$0 sps:$4 sm:$0x11]  }
  0xc7   : > { %2497 = vrot.lane.b32.xlu0 %v2366_v46, %s4338_s24  ;;  %v588_v46 = vrot.slane %v586_v40, 1  ;;  %v1583_v40 = vshll.u32 %v4285_v63, 16 }
  0xc8   : > { %v709_v47 = vpop.permute.xlu1 %708  ;;  %v680_v43 = vor.u32 %v679_v36, %v675_v14  ;;  %v583_v44 = vrot.slane %v581_v37, 1  ;;  %v4286_v36 = vld [vmem:[%s4374_s17 + $0x60] sm:$0xff]  }
  0xc9   : > { %746 = vst.msk [vmem:[#allocation2 + $0x58] sm:$0xff] %vm734_vm3, %v709_v47  ;;  %v693_v50 = vpop.permute.xlu0 %692  ;;  %v970_v47 = vrot.slane %v4268_v42, 1 }
  0xca   : > { %738 = vst.msk [vmem:[#allocation2 + $0x18] sm:$0xff] %vm734_vm3, %v693_v50  ;;  %2800 = vrot.lane.b32.xlu1 %v2766_v54, %s4339_s25  ;;  %v685_v48 = vsel %vm493_vm1, %v680_v43, %v684_v39  ;;  %v584_v49 = vor.u32 %v583_v44, %v579_v32  ;;  %v971_v50 = vrot.slane %v4269_v45, 1  ;;  %v1480_v43 = vshrl.u32 %v4286_v36, 16 }
  0xcb   : > { %2784 = vrot.lane.b32.xlu0 %v2742_v61, %s4339_s25  ;;  %v948_v61 = vsel %vm927_vm0, %v946_v57, %v947_v58  ;;  %v1482_v44 = vshll.u32 %v4286_v36, 16  ;;  %v1871_v58 = vrot.slane %v4289_v52, 1  ;;  %v4306_v36 = vld [vmem:[%s4374_s17 + $0xcc] sm:$0xff]  }
  0xcc   : > { %v997_v59 = vpop.permute.xlu1 %996  ;;  %v2850_v60 = vld [vmem:[#allocation2 + $0x48] sm:$0xff]  ;;  %v589_v55 = vsel %vm493_vm1, %v584_v49, %v588_v46  ;;  %v972_v56 = vsel %vm927_vm0, %v970_v47, %v971_v50  ;;  %v1585_v46 = vrot.slane %v1583_v40, 1 }
  0xcd   : > { %1035 = vst.msk [vmem:[#allocation2 + $0x50] sm:$0xff] %vm1024_vm4, %v997_v59  ;;  %v981_v62 = vpop.permute.xlu0 %980  ;;  %v2842_v0 = vld [vmem:[#allocation2 + $0x8] sm:$0xff]  ;;  %4041 = vmatmul.mubr.msk.bf16.vlgmr.msra.gmra.mrb[0].mxu1 %vm2884_vm11, %v2850_v60  ;;  %v4272_v59 = vld [vmem:[%s4374_s17 + $0xb4] sm:$0xfe]   ;;  %v1484_v50 = vrot.slane %v1482_v44, 1  ;;  %v2478_v44 = vshll.u32 %v4306_v36, 16 }
  0xce   : > { %1027 = vst.msk [vmem:[#allocation2 + $0x10] sm:$0xff] %vm1024_vm4, %v981_v62  ;;  %4025 = vmatmul.mubr.msk.bf16.vlgmr.msra.gmra.mrb[0].mxu0 %vm2884_vm11, %v2842_v0  ;;  %714 = vrot.lane.b32.xlu1 %v673_v15, %s4334_s20  ;;  %v4273_v60 = vld [vmem:[%s4374_s17 + $0xbc] ss:$0 sps:$4 sm:$0x11]   ;;  %v973_v62 = vrot.slane %v4272_v59, 1  ;;  %v4308_v40 = vld [vmem:[%s4374_s17 + $0x6c] sm:$0xff]  }
  0xcf   : > { %698 = vrot.lane.b32.xlu0 %v577_v27, %s4334_s20  ;;  %v4274_v0 = vld [vmem:[%s4374_s17 + $0x54] sm:$0xfe]   ;;  %v974_v2 = vrot.slane %v4273_v60, 1  ;;  %v4281_v15 = vld [vmem:[%s4374_s17 + $0xbc] ss:$0 sps:$4 sm:$0x11]   ;;  %v1485_v57 = vor.u32 %v1484_v50, %v1480_v43 }
  0xd0   : > { %v999_v12 = vpop.permute.xlu1 %998  ;;  %v949_v5 = vrot.slane %v4274_v0, 1  ;;  %v1571_v21 = vshll.u32 %v4281_v15, 16  ;;  %v1470_v27 = vshll.u32 %v4282_v11, 16  ;;  %v4290_v59 = vld [vmem:[%s4374_s17 + $0x54] sm:$0xfe]   ;;  %v4296_v11 = vld [vmem:[%s4374_s17 + $0xc0] sm:$0xff]  }
  0xd1   : > { %1036 = vst.msk [vmem:[#allocation2 + $0x58] sm:$0xff] %vm1024_vm4, %v999_v12  ;;  %v983_v17 = vpop.permute.xlu0 %982  ;;  %v975_v6 = vsel %vm927_vm0, %v973_v62, %v974_v2  ;;  %v4291_v60 = vld [vmem:[%s4374_s17 + $0x5c] ss:$0 sps:$4 sm:$0x11]   ;;  %v1846_v62 = vrot.slane %v4290_v59, 1  ;;  %v2476_v43 = vshrl.u32 %v4306_v36, 16 }
  0xd2   : > { %1028 = vst.msk [vmem:[#allocation2 + $0x18] sm:$0xff] %vm1024_vm4, %v983_v17  ;;  %2802 = vrot.lane.b32.xlu1 %v2769_v22, %s4339_s25  ;;  %v951_v12 = vsel %vm927_vm0, %v949_v5, %v950_v7  ;;  %v1566_v17 = vshll.u32 %v4280_v9, 16  ;;  %v4284_v22 = vld [vmem:[%s4374_s17 + $0xc0] sm:$0xff]   ;;  %v1573_v29 = vrot.slane %v1571_v21, 1  ;;  %v1472_v31 = vrot.slane %v1470_v27, 1  ;;  %v4298_v27 = vld [vmem:[%s4374_s17 + $0xcc] sm:$0xff]  }
  0xd3   : > { %2786 = vrot.lane.b32.xlu0 %v2745_v33, %s4339_s25  ;;  %v1576_v32 = vshrl.u32 %v4284_v22, 16  ;;  %v1578_v33 = vshll.u32 %v4284_v22, 16  ;;  %v1847_v0 = vrot.slane %v4291_v60, 1  ;;  %v4292_v2 = vld [vmem:[%s4374_s17 + $0xc0] sm:$0xfe]   ;;  %v2480_v52 = vrot.slane %v2478_v44, 1 }
  0xd4   : > { %v1175_v26 = vpop.permute.xlu1 %1174  ;;  %v1568_v20 = vrot.slane %v1566_v17, 1  ;;  %v1473_v37 = vor.u32 %v1472_v31, %v1468_v24  ;;  %v4294_v7 = vld [vmem:[%s4374_s17 + $0x60] sm:$0xfe]   ;;  %v4295_v9 = vld [vmem:[%s4374_s17 + $0x68] ss:$0 sps:$4 sm:$0x11]  }
  0xd5   : > { %1213 = vst.msk [vmem:[#allocation2 + $0x50] sm:$0xff] %vm1202_vm5, %v1175_v26  ;;  %v1159_v30 = vpop.permute.xlu0 %1158  ;;  %v1580_v39 = vrot.slane %v1578_v33, 1  ;;  %v4297_v21 = vld [vmem:[%s4374_s17 + $0x60] sm:$0xff]   ;;  %v4305_v31 = vld [vmem:[%s4374_s17 + $0x68] ss:$0 sps:$4 sm:$0x11]  }
  0xd6   : > { %1205 = vst.msk [vmem:[#allocation2 + $0x10] sm:$0xff] %vm1202_vm5, %v1159_v30  ;;  %716 = vrot.lane.b32.xlu1 %v685_v48, %s4334_s20  ;;  %v1569_v28 = vor.u32 %v1568_v20, %v1564_v16  ;;  %v1475_v30 = vshll.u32 %v4283_v23, 16  ;;  %v4288_v48 = vld [vmem:[%s4374_s17 + $0xb4] sm:$0xfe]   ;;  %v4302_v24 = vld [vmem:[%s4374_s17 + $0xc0] sm:$0xff]   ;;  %v4299_v33 = vld [vmem:[%s4374_s17 + $0x6c] sm:$0xff]  }
  0xd7   : > { %700 = vrot.lane.b32.xlu0 %v589_v55, %s4334_s20  ;;  %v1581_v45 = vor.u32 %v1580_v39, %v1576_v32  ;;  %v1870_v55 = vrot.slane %v4288_v48, 1  ;;  %v4300_v16 = vld [vmem:[%s4374_s17 + $0x90] sm:$0xff]   ;;  %v2464_v22 = vshrl.u32 %v4302_v24, 16  ;;  %v2375_v39 = vshll.u32 %v4305_v31, 16  ;;  %v4311_v60 = vld [vmem:[%s4374_s17 + $0x3c] sm:$0xff]  }
  0xd8   : > { %v1177_v38 = vpop.permute.xlu1 %1176  ;;  %v1477_v34 = vrot.slane %v1475_v30, 1  ;;  %v1574_v42 = vsel %vm493_vm1, %v1569_v28, %v1573_v29  ;;  %313 = vst.msk [vmem:[#allocation2 + $0x60] sm:$0xff] %vm300_vm2, %v4300_v16  ;;  %v4301_v20 = vld [vmem:[%s4374_s17 + $0x30] sm:$0xff]   ;;  %v2466_v28 = vshll.u32 %v4302_v24, 16  ;;  %306 = vst.msk [vmem:[#allocation2 + $0x28] sm:$0xff] %vm300_vm2, %v4311_v60  ;;  %v4321_v24 = vld [vmem:[%s4374_s17 + $0x48] sm:$0xff]  }
  0xd9   : > { %1214 = vst.msk [vmem:[#allocation2 + $0x58] sm:$0xff] %vm1202_vm5, %v1177_v38  ;;  %v1161_v41 = vpop.permute.xlu0 %1160  ;;  %v1872_v5 = vsel %vm927_vm0, %v1870_v55, %v1871_v58  ;;  %v2481_v58 = vor.u32 %v2480_v52, %v2476_v43 }
  0xda   : > { %1206 = vst.msk [vmem:[#allocation2 + $0x18] sm:$0xff] %vm1202_vm5, %v1161_v41  ;;  %1004 = vrot.lane.b32.xlu1 %v972_v56, %s4333_s19  ;;  %v4287_v41 = vld [vmem:[%s4374_s17 + $0x68] ss:$0 sps:$4 sm:$0x11]   ;;  %v1478_v49 = vsel %vm493_vm1, %v1473_v37, %v1477_v34  ;;  %v1586_v56 = vsel %vm493_vm1, %v1581_v45, %v1585_v46  ;;  %v4310_v45 = vld [vmem:[%s4374_s17 + $0x9c] sm:$0xff]  }
  0xdb   : > { %988 = vrot.lane.b32.xlu0 %v948_v61, %s4333_s19  ;;  %v1487_v47 = vshll.u32 %v4287_v41, 16  ;;  %305 = vst.msk [vmem:[#allocation2 + $0x20] sm:$0xff] %vm300_vm2, %v4301_v20  ;;  %314 = vst.msk [vmem:[#allocation2 + $0x68] sm:$0xff] %vm300_vm2, %v4310_v45 }
  0xdc   : > { %v1608_v53 = vpop.permute.xlu1 %1607  ;;  %307 = vst.msk [vmem:[#allocation2 + $0x30] sm:$0xff] %vm300_vm2, %v4321_v24 }
  0xdd   : > { %1646 = vst.msk [vmem:[#allocation2 + $0x50] sm:$0xff] %vm1635_vm6, %v1608_v53  ;;  %v1592_v54 = vpop.permute.xlu0 %1591  ;;  %v1489_v53 = vrot.slane %v1487_v47, 1  ;;  %v2377_v47 = vrot.slane %v2375_v39, 1 }
  0xde   : > { %1638 = vst.msk [vmem:[#allocation2 + $0x10] sm:$0xff] %vm1635_vm6, %v1592_v54  ;;  %1006 = vrot.lane.b32.xlu1 %v975_v6, %s4333_s19  ;;  %v1873_v6 = vrot.slane %v4292_v2, 1  ;;  %v4312_v2 = vld [vmem:[%s4374_s17 + $0xc0] sm:$0xfe]  }
  0xdf   : > { %990 = vrot.lane.b32.xlu0 %v951_v12, %s4333_s19  ;;  %v1490_v61 = vsel %vm493_vm1, %v1485_v57, %v1489_v53  ;;  %v1849_v12 = vrot.slane %v4294_v7, 1  ;;  %v2382_v57 = vshll.u32 %v4308_v40, 16 }
  0xe0   : > { %v1610_v1 = vpop.permute.xlu1 %1609 }
  0xe1   : > { %1647 = vst.msk [vmem:[#allocation2 + $0x58] sm:$0xff] %vm1635_vm6, %v1610_v1  ;;  %v1594_v4 = vpop.permute.xlu0 %1593 }
  0xe2   : > { %1639 = vst.msk [vmem:[#allocation2 + $0x18] sm:$0xff] %vm1635_vm6, %v1594_v4  ;;  %1182 = vrot.lane.b32.xlu1 %v4276_v8, %s4332_s18  ;;  %v4293_v4 = vld [vmem:[%s4374_s17 + $0xc8] ss:$0 sps:$4 sm:$0x11]  }
  0xe3   : > { %1166 = vrot.lane.b32.xlu0 %v4277_v13, %s4332_s18  ;;  %v1874_v8 = vrot.slane %v4293_v4, 1 }
  0xe4   : > { %v1897_v10 = vpop.permute.xlu1 %1896 }
  0xe5   : > { %1935 = vst.msk [vmem:[#allocation2 + $0x50] sm:$0xff] %vm1924_vm7, %v1897_v10  ;;  %v1881_v14 = vpop.permute.xlu0 %1880  ;;  %v1848_v10 = vsel %vm927_vm0, %v1846_v62, %v1847_v0  ;;  %v1875_v17 = vsel %vm927_vm0, %v1873_v6, %v1874_v8  ;;  %v2384_v62 = vrot.slane %v2382_v57, 1  ;;  %v4313_v6 = vld [vmem:[%s4374_s17 + $0xc8] ss:$0 sps:$4 sm:$0x11]   ;;  %v2770_v8 = vrot.slane %v4312_v2, 1 }
  0xe6   : > { %1927 = vst.msk [vmem:[#allocation2 + $0x10] sm:$0xff] %vm1924_vm7, %v1881_v14  ;;  %1184 = vrot.lane.b32.xlu1 %v4278_v18, %s4332_s18  ;;  %v1850_v14 = vrot.slane %v4295_v9, 1  ;;  %v4320_v9 = vld [vmem:[%s4374_s17 + $0xa8] sm:$0xff]  }
  0xe7   : > { %1168 = vrot.lane.b32.xlu0 %v4279_v25, %s4332_s18  ;;  %v4303_v25 = vld [vmem:[%s4374_s17 + $0xc8] ss:$0 sps:$4 sm:$0x11]   ;;  %315 = vst.msk [vmem:[#allocation2 + $0x70] sm:$0xff] %vm300_vm2, %v4320_v9 }
  0xe8   : > { %v1899_v19 = vpop.permute.xlu1 %1898  ;;  %v1851_v18 = vsel %vm927_vm0, %v1849_v12, %v1850_v14  ;;  %v2471_v30 = vshll.u32 %v4303_v25, 16  ;;  %v2771_v12 = vrot.slane %v4313_v6, 1  ;;  %v4315_v14 = vld [vmem:[%s4374_s17 + $0x68] ss:$0 sps:$4 sm:$0x11]  }
  0xe9   : > { %1936 = vst.msk [vmem:[#allocation2 + $0x58] sm:$0xff] %vm1924_vm7, %v1899_v19  ;;  %v1883_v26 = vpop.permute.xlu0 %1882 }
  0xea   : > { %1928 = vst.msk [vmem:[#allocation2 + $0x18] sm:$0xff] %vm1924_vm7, %v1883_v26  ;;  %1615 = vrot.lane.b32.xlu1 %v1574_v42, %s4335_s21  ;;  %v4304_v26 = vld [vmem:[%s4374_s17 + $0x60] sm:$0xff]   ;;  %v2473_v37 = vrot.slane %v2471_v30, 1  ;;  %v4307_v42 = vld [vmem:[%s4374_s17 + $0xd4] ss:$0 sps:$4 sm:$0x11]  }
  0xeb   : > { %1599 = vrot.lane.b32.xlu0 %v1478_v49, %s4335_s21  ;;  %v2368_v63 = vshrl.u32 %v4304_v26, 16  ;;  %v2370_v32 = vshll.u32 %v4304_v26, 16  ;;  %v2483_v53 = vshll.u32 %v4307_v42, 16  ;;  %v4322_v30 = vld [vmem:[%s4374_s17 + $0xb4] sm:$0xff]  }
  0xec   : > { %v2075_v35 = vpop.permute.xlu1 %2074  ;;  %316 = vst.msk [vmem:[#allocation2 + $0x78] sm:$0xff] %vm300_vm2, %v4322_v30 }
  0xed   : > { %2113 = vst.msk [vmem:[#allocation2 + $0x50] sm:$0xff] %vm2102_vm8, %v2075_v35  ;;  %v2059_v38 = vpop.permute.xlu0 %2058  ;;  %v2468_v35 = vrot.slane %v2466_v28, 1  ;;  %v2485_v59 = vrot.slane %v2483_v53, 1 }
  0xee   : > { %2105 = vst.msk [vmem:[#allocation2 + $0x10] sm:$0xff] %vm2102_vm8, %v2059_v38  ;;  %1617 = vrot.lane.b32.xlu1 %v1586_v56, %s4335_s21  ;;  %v2372_v38 = vrot.slane %v2370_v32, 1  ;;  %v4309_v56 = vld [vmem:[%s4374_s17 + $0x74] ss:$0 sps:$4 sm:$0x11]  }
  0xef   : > { %1601 = vrot.lane.b32.xlu0 %v1490_v61, %s4335_s21  ;;  %v2469_v41 = vor.u32 %v2468_v35, %v2464_v22  ;;  %v2387_v0 = vshll.u32 %v4309_v56, 16  ;;  %v4318_v22 = vld [vmem:[%s4374_s17 + $0x6c] sm:$0xfe]  }
  0xf0   : > { %v2077_v51 = vpop.permute.xlu1 %2076  ;;  %v2373_v46 = vor.u32 %v2372_v38, %v2368_v63  ;;  %v2749_v63 = vrot.slane %v4318_v22, 1 }
  0xf1   : > { %2114 = vst.msk [vmem:[#allocation2 + $0x58] sm:$0xff] %vm2102_vm8, %v2077_v51  ;;  %v2061_v54 = vpop.permute.xlu0 %2060  ;;  %v2474_v55 = vsel %vm493_vm1, %v2469_v41, %v2473_v37 }
  0xf2   : > { %2106 = vst.msk [vmem:[#allocation2 + $0x18] sm:$0xff] %vm2102_vm8, %v2061_v54  ;;  %1904 = vrot.lane.b32.xlu1 %v1872_v5, %s4336_s22  ;;  %v2380_v54 = vshrl.u32 %v4308_v40, 16  ;;  %v2378_v61 = vsel %vm493_vm1, %v2373_v46, %v2377_v47  ;;  %v2389_v5 = vrot.slane %v2387_v0, 1 }
  0xf3   : > { %1888 = vrot.lane.b32.xlu0 %v1848_v10, %s4336_s22 }
  0xf4   : > { %v2508_v1 = vpop.permute.xlu1 %2507  ;;  %v2385_v4 = vor.u32 %v2384_v62, %v2380_v54 }
  0xf5   : > { %2546 = vst.msk [vmem:[#allocation2 + $0x50] sm:$0xff] %vm2535_vm9, %v2508_v1  ;;  %v2492_v3 = vpop.permute.xlu0 %2491 }
  0xf6   : > { %2538 = vst.msk [vmem:[#allocation2 + $0x10] sm:$0xff] %vm2535_vm9, %v2492_v3  ;;  %1906 = vrot.lane.b32.xlu1 %v1875_v17, %s4336_s22  ;;  %v2486_v3 = vsel %vm493_vm1, %v2481_v58, %v2485_v59  ;;  %v2390_v10 = vsel %vm493_vm1, %v2385_v4, %v2389_v5 }
  0xf7   : > { %1890 = vrot.lane.b32.xlu0 %v1851_v18, %s4336_s22 }
  0xf8   : > { %v2510_v13 = vpop.permute.xlu1 %2509 }
  0xf9   : > { %2547 = vst.msk [vmem:[#allocation2 + $0x58] sm:$0xff] %vm2535_vm9, %v2510_v13  ;;  %v2494_v15 = vpop.permute.xlu0 %2493  ;;  %v4314_v13 = vld [vmem:[%s4374_s17 + $0x60] sm:$0xfe]  }
  0xfa   : > { %2539 = vst.msk [vmem:[#allocation2 + $0x18] sm:$0xff] %vm2535_vm9, %v2494_v15  ;;  %2082 = vrot.lane.b32.xlu1 %v4296_v11, %s4337_s23  ;;  %v2772_v11 = vsel %vm927_vm0, %v2770_v8, %v2771_v12  ;;  %v2746_v18 = vrot.slane %v4314_v13, 1 }
  0xfb   : > { %2066 = vrot.lane.b32.xlu0 %v4297_v21, %s4337_s23  ;;  %v4316_v21 = vld [vmem:[%s4374_s17 + $0xcc] sm:$0xfe]  }
  0xfc   : > { %v2797_v19 = vpop.permute.xlu1 %2796  ;;  %v2773_v26 = vrot.slane %v4316_v21, 1 }
  0xfd   : > { %2835 = vst.msk [vmem:[#allocation2 + $0x50] sm:$0xff] %vm2824_vm10, %v2797_v19  ;;  %v2781_v23 = vpop.permute.xlu0 %2780  ;;  %v2747_v19 = vrot.slane %v4315_v14, 1 }
  0xfe   : > { %2827 = vst.msk [vmem:[#allocation2 + $0x10] sm:$0xff] %vm2824_vm10, %v2781_v23  ;;  %2084 = vrot.lane.b32.xlu1 %v4298_v27, %s4337_s23  ;;  %v4317_v23 = vld [vmem:[%s4374_s17 + $0xd4] ss:$0 sps:$4 sm:$0x11]  }
  0xff   : > { %2068 = vrot.lane.b32.xlu0 %v4299_v33, %s4337_s23  ;;  %v2748_v25 = vsel %vm927_vm0, %v2746_v18, %v2747_v19  ;;  %v2774_v27 = vrot.slane %v4317_v23, 1  ;;  %v4323_v33 = vld [vmem:[%s4374_s17 + $0x54] sm:$0xff]  }
 0x100   : > { %v711_v29 = vpop.permute.xlu1 %710  ;;  %308 = vst.msk [vmem:[#allocation2 + $0x38] sm:$0xff] %vm300_vm2, %v4323_v33 }
 0x101   : > { %747 = vst.msk [vmem:[#allocation2 + $0x60] sm:$0xff] %vm734_vm3, %v711_v29  ;;  %v695_v34 = vpop.permute.xlu0 %694  ;;  %v4319_v29 = vld [vmem:[%s4374_s17 + $0x74] ss:$0 sps:$4 sm:$0x11]   ;;  %v2775_v31 = vsel %vm927_vm0, %v2773_v26, %v2774_v27 }
 0x102   : > { %739 = vst.msk [vmem:[#allocation2 + $0x20] sm:$0xff] %vm734_vm3, %v695_v34  ;;  %2515 = vrot.lane.b32.xlu1 %v2474_v55, %s4338_s24  ;;  %v2750_v34 = vrot.slane %v4319_v29, 1 }
 0x103   : > { %2499 = vrot.lane.b32.xlu0 %v2378_v61, %s4338_s24 }
 0x104   : > { %v2799_v48 = vpop.permute.xlu1 %2798  ;;  %v2851_v49 = vld [vmem:[#allocation2 + $0x50] sm:$0xff]  ;;  %v2751_v36 = vsel %vm927_vm0, %v2749_v63, %v2750_v34 }
 0x105   : > { %2836 = vst.msk [vmem:[#allocation2 + $0x58] sm:$0xff] %vm2824_vm10, %v2799_v48  ;;  %v2783_v50 = vpop.permute.xlu0 %2782  ;;  %v2843_v51 = vld [vmem:[#allocation2 + $0x10] sm:$0xff]  ;;  %4044 = vmatprep.mubr.msk.bf16.mxu1 %vm2884_vm11, %v2851_v49 }
 0x106   : > { %2828 = vst.msk [vmem:[#allocation2 + $0x18] sm:$0xff] %vm2824_vm10, %v2783_v50  ;;  %4028 = vmatprep.mubr.msk.bf16.mxu0 %vm2884_vm11, %v2843_v51  ;;  %2517 = vrot.lane.b32.xlu1 %v2486_v3, %s4338_s24 }
 0x107   : > { %2501 = vrot.lane.b32.xlu0 %v2390_v10, %s4338_s24 }
 0x108   : > { %v713_v1 = vpop.permute.xlu1 %712 }
 0x109   : > { %748 = vst.msk [vmem:[#allocation2 + $0x68] sm:$0xff] %vm734_vm3, %v713_v1  ;;  %v697_v7 = vpop.permute.xlu0 %696 }
 0x10a   : > { %740 = vst.msk [vmem:[#allocation2 + $0x28] sm:$0xff] %vm734_vm3, %v697_v7  ;;  %2804 = vrot.lane.b32.xlu1 %v2772_v11, %s4339_s25 }
 0x10b   : > { %2788 = vrot.lane.b32.xlu0 %v2748_v25, %s4339_s25 }
 0x10c   : > { %v1001_v15 = vpop.permute.xlu1 %1000  ;;  %v2852_v17 = vld [vmem:[#allocation2 + $0x58] sm:$0xff] }
 0x10d   : > { %v2844_v16 = vld [vmem:[#allocation2 + $0x18] sm:$0xff]  ;;  %1037 = vst.msk [vmem:[#allocation2 + $0x60] sm:$0xff] %vm1024_vm4, %v1001_v15  ;;  %4045 = vmatmul.mubr.msk.bf16.gmra.mrb[4].mxu1 %vm2884_vm11, %v2852_v17  ;;  %v985_v20 = vpop.permute.xlu0 %984 }
 0x10e   : > { %4029 = vmatmul.mubr.msk.bf16.gmra.mrb[4].mxu0 %vm2884_vm11, %v2844_v16  ;;  %1029 = vst.msk [vmem:[#allocation2 + $0x20] sm:$0xff] %vm1024_vm4, %v985_v20  ;;  %2806 = vrot.lane.b32.xlu1 %v2775_v31, %s4339_s25 }
 0x10f   : > { %2790 = vrot.lane.b32.xlu0 %v2751_v36, %s4339_s25  ;;  %v5024_v36 = vld [vmem:[%s5085_s2] ss:$0 sm:$0xff] }
 0x110   : > { %v1003_v28 = vpop.permute.xlu1 %1002 }
 0x111   : > { %1038 = vst.msk [vmem:[#allocation2 + $0x68] sm:$0xff] %vm1024_vm4, %v1003_v28  ;;  %v987_v32 = vpop.permute.xlu0 %986 }
 0x112   : > { %1030 = vst.msk [vmem:[#allocation2 + $0x28] sm:$0xff] %vm1024_vm4, %v987_v32 }
 0x114   : > { %v1179_v35 = vpop.permute.xlu1 %1178 }
 0x115   : > { %1215 = vst.msk [vmem:[#allocation2 + $0x60] sm:$0xff] %vm1202_vm5, %v1179_v35  ;;  %v1163_v37 = vpop.permute.xlu0 %1162 }
 0x116   : > { %1207 = vst.msk [vmem:[#allocation2 + $0x20] sm:$0xff] %vm1202_vm5, %v1163_v37 }
 0x118   : > { %v1181_v38 = vpop.permute.xlu1 %1180 }
 0x119   : > { %1216 = vst.msk [vmem:[#allocation2 + $0x68] sm:$0xff] %vm1202_vm5, %v1181_v38  ;;  %v1165_v39 = vpop.permute.xlu0 %1164 }
 0x11a   : > { %1208 = vst.msk [vmem:[#allocation2 + $0x28] sm:$0xff] %vm1202_vm5, %v1165_v39 }
 0x11c   : > { %v1612_v40 = vpop.permute.xlu1 %1611 }
 0x11d   : > { %1648 = vst.msk [vmem:[#allocation2 + $0x60] sm:$0xff] %vm1635_vm6, %v1612_v40  ;;  %v1596_v41 = vpop.permute.xlu0 %1595 }
 0x11e   : > { %1640 = vst.msk [vmem:[#allocation2 + $0x20] sm:$0xff] %vm1635_vm6, %v1596_v41 }
 0x120   : > { %v1614_v42 = vpop.permute.xlu1 %1613 }
 0x121   : > { %1649 = vst.msk [vmem:[#allocation2 + $0x68] sm:$0xff] %vm1635_vm6, %v1614_v42  ;;  %v1598_v43 = vpop.permute.xlu0 %1597 }
 0x122   : > { %1641 = vst.msk [vmem:[#allocation2 + $0x28] sm:$0xff] %vm1635_vm6, %v1598_v43 }
 0x124   : > { %v1901_v44 = vpop.permute.xlu1 %1900 }
 0x125   : > { %1937 = vst.msk [vmem:[#allocation2 + $0x60] sm:$0xff] %vm1924_vm7, %v1901_v44  ;;  %v1885_v45 = vpop.permute.xlu0 %1884 }
 0x126   : > { %1929 = vst.msk [vmem:[#allocation2 + $0x20] sm:$0xff] %vm1924_vm7, %v1885_v45 }
 0x128   : > { %v1903_v46 = vpop.permute.xlu1 %1902 }
 0x129   : > { %1938 = vst.msk [vmem:[#allocation2 + $0x68] sm:$0xff] %vm1924_vm7, %v1903_v46  ;;  %v1887_v47 = vpop.permute.xlu0 %1886 }
 0x12a   : > { %1930 = vst.msk [vmem:[#allocation2 + $0x28] sm:$0xff] %vm1924_vm7, %v1887_v47 }
 0x12c   : > { %v2079_v48 = vpop.permute.xlu1 %2078 }
 0x12d   : > { %2115 = vst.msk [vmem:[#allocation2 + $0x60] sm:$0xff] %vm2102_vm8, %v2079_v48  ;;  %v2063_v49 = vpop.permute.xlu0 %2062 }
 0x12e   : > { %2107 = vst.msk [vmem:[#allocation2 + $0x20] sm:$0xff] %vm2102_vm8, %v2063_v49 }
 0x130   : > { %v2081_v50 = vpop.permute.xlu1 %2080 }
 0x131   : > { %2116 = vst.msk [vmem:[#allocation2 + $0x68] sm:$0xff] %vm2102_vm8, %v2081_v50  ;;  %v2065_v51 = vpop.permute.xlu0 %2064 }
 0x132   : > { %2108 = vst.msk [vmem:[#allocation2 + $0x28] sm:$0xff] %vm2102_vm8, %v2065_v51 }
 0x134   : > { %v2512_v52 = vpop.permute.xlu1 %2511 }
 0x135   : > { %2548 = vst.msk [vmem:[#allocation2 + $0x60] sm:$0xff] %vm2535_vm9, %v2512_v52  ;;  %v2496_v53 = vpop.permute.xlu0 %2495 }
 0x136   : > { %2540 = vst.msk [vmem:[#allocation2 + $0x20] sm:$0xff] %vm2535_vm9, %v2496_v53 }
 0x138   : > { %v2514_v54 = vpop.permute.xlu1 %2513 }
 0x139   : > { %2549 = vst.msk [vmem:[#allocation2 + $0x68] sm:$0xff] %vm2535_vm9, %v2514_v54  ;;  %v2498_v55 = vpop.permute.xlu0 %2497 }
 0x13a   : > { %2541 = vst.msk [vmem:[#allocation2 + $0x28] sm:$0xff] %vm2535_vm9, %v2498_v55 }
 0x13c   : > { %v2801_v56 = vpop.permute.xlu1 %2800 }
 0x13d   : > { %2837 = vst.msk [vmem:[#allocation2 + $0x60] sm:$0xff] %vm2824_vm10, %v2801_v56  ;;  %v2785_v57 = vpop.permute.xlu0 %2784 }
 0x13e   : > { %2829 = vst.msk [vmem:[#allocation2 + $0x20] sm:$0xff] %vm2824_vm10, %v2785_v57 }
 0x140   : > { %v715_v58 = vpop.permute.xlu1 %714 }
 0x141   : > { %749 = vst.msk [vmem:[#allocation2 + $0x70] sm:$0xff] %vm734_vm3, %v715_v58  ;;  %v699_v60 = vpop.permute.xlu0 %698 }
 0x142   : > { %741 = vst.msk [vmem:[#allocation2 + $0x30] sm:$0xff] %vm734_vm3, %v699_v60 }
 0x144   : > { %v2853_v59 = vld [vmem:[#allocation2 + $0x60] sm:$0xff]  ;;  %v2803_v61 = vpop.permute.xlu1 %2802 }
 0x145   : > { %4048 = vmatprep.mubr.msk.bf16.mxu1 %vm2884_vm11, %v2853_v59  ;;  %v2845_v62 = vld [vmem:[#allocation2 + $0x20] sm:$0xff]  ;;  %2838 = vst.msk [vmem:[#allocation2 + $0x68] sm:$0xff] %vm2824_vm10, %v2803_v61  ;;  %v2787_v0 = vpop.permute.xlu0 %2786 }
 0x146   : > { %4032 = vmatprep.mubr.msk.bf16.mxu0 %vm2884_vm11, %v2845_v62  ;;  %2830 = vst.msk [vmem:[#allocation2 + $0x28] sm:$0xff] %vm2824_vm10, %v2787_v0 }
 0x148   : > { %v717_v1 = vpop.permute.xlu1 %716 }
 0x149   : > { %750 = vst.msk [vmem:[#allocation2 + $0x78] sm:$0xff] %vm734_vm3, %v717_v1  ;;  %v701_v3 = vpop.permute.xlu0 %700 }
 0x14a   : > { %742 = vst.msk [vmem:[#allocation2 + $0x38] sm:$0xff] %vm734_vm3, %v701_v3 }
 0x14c   : > { %v2854_v2 = vld [vmem:[#allocation2 + $0x68] sm:$0xff]  ;;  %v1005_v4 = vpop.permute.xlu1 %1004 }
 0x14d   : > { %4049 = vmatmul.mubr.msk.bf16.gmra.mrb[8].mxu1 %vm2884_vm11, %v2854_v2  ;;  %1039 = vst.msk [vmem:[#allocation2 + $0x70] sm:$0xff] %vm1024_vm4, %v1005_v4  ;;  %v2846_v5 = vld [vmem:[#allocation2 + $0x28] sm:$0xff]  ;;  %v989_v6 = vpop.permute.xlu0 %988 }
 0x14e   : > { %4033 = vmatmul.mubr.msk.bf16.gmra.mrb[8].mxu0 %vm2884_vm11, %v2846_v5  ;;  %1031 = vst.msk [vmem:[#allocation2 + $0x30] sm:$0xff] %vm1024_vm4, %v989_v6 }
 0x150   : > { %v1007_v7 = vpop.permute.xlu1 %1006 }
 0x151   : > { %1040 = vst.msk [vmem:[#allocation2 + $0x78] sm:$0xff] %vm1024_vm4, %v1007_v7  ;;  %v991_v8 = vpop.permute.xlu0 %990 }
 0x152   : > { %1032 = vst.msk [vmem:[#allocation2 + $0x38] sm:$0xff] %vm1024_vm4, %v991_v8 }
 0x154   : > { %v1183_v9 = vpop.permute.xlu1 %1182 }
 0x155   : > { %1217 = vst.msk [vmem:[#allocation2 + $0x70] sm:$0xff] %vm1202_vm5, %v1183_v9  ;;  %v1167_v10 = vpop.permute.xlu0 %1166 }
 0x156   : > { %1209 = vst.msk [vmem:[#allocation2 + $0x30] sm:$0xff] %vm1202_vm5, %v1167_v10 }
 0x158   : > { %v1185_v12 = vpop.permute.xlu1 %1184 }
 0x159   : > { %1218 = vst.msk [vmem:[#allocation2 + $0x78] sm:$0xff] %vm1202_vm5, %v1185_v12  ;;  %v1169_v13 = vpop.permute.xlu0 %1168 }
 0x15a   : > { %1210 = vst.msk [vmem:[#allocation2 + $0x38] sm:$0xff] %vm1202_vm5, %v1169_v13 }
 0x15c   : > { %v1616_v14 = vpop.permute.xlu1 %1615 }
 0x15d   : > { %1650 = vst.msk [vmem:[#allocation2 + $0x70] sm:$0xff] %vm1635_vm6, %v1616_v14  ;;  %v1600_v15 = vpop.permute.xlu0 %1599 }
 0x15e   : > { %1642 = vst.msk [vmem:[#allocation2 + $0x30] sm:$0xff] %vm1635_vm6, %v1600_v15 }
 0x160   : > { %v1618_v16 = vpop.permute.xlu1 %1617 }
 0x161   : > { %1651 = vst.msk [vmem:[#allocation2 + $0x78] sm:$0xff] %vm1635_vm6, %v1618_v16  ;;  %v1602_v17 = vpop.permute.xlu0 %1601 }
 0x162   : > { %1643 = vst.msk [vmem:[#allocation2 + $0x38] sm:$0xff] %vm1635_vm6, %v1602_v17 }
 0x164   : > { %v1905_v11 = vpop.permute.xlu1 %1904 }
 0x165   : > { %1939 = vst.msk [vmem:[#allocation2 + $0x70] sm:$0xff] %vm1924_vm7, %v1905_v11  ;;  %v1889_v18 = vpop.permute.xlu0 %1888 }
 0x166   : > { %1931 = vst.msk [vmem:[#allocation2 + $0x30] sm:$0xff] %vm1924_vm7, %v1889_v18 }
 0x168   : > { %v1907_v19 = vpop.permute.xlu1 %1906 }
 0x169   : > { %1940 = vst.msk [vmem:[#allocation2 + $0x78] sm:$0xff] %vm1924_vm7, %v1907_v19  ;;  %v1891_v20 = vpop.permute.xlu0 %1890 }
 0x16a   : > { %1932 = vst.msk [vmem:[#allocation2 + $0x38] sm:$0xff] %vm1924_vm7, %v1891_v20 }
 0x16c   : > { %v2083_v21 = vpop.permute.xlu1 %2082 }
 0x16d   : > { %2117 = vst.msk [vmem:[#allocation2 + $0x70] sm:$0xff] %vm2102_vm8, %v2083_v21  ;;  %v2067_v23 = vpop.permute.xlu0 %2066 }
 0x16e   : > { %2109 = vst.msk [vmem:[#allocation2 + $0x30] sm:$0xff] %vm2102_vm8, %v2067_v23 }
 0x170   : > { %v2085_v24 = vpop.permute.xlu1 %2084 }
 0x171   : > { %2118 = vst.msk [vmem:[#allocation2 + $0x78] sm:$0xff] %vm2102_vm8, %v2085_v24  ;;  %v2069_v25 = vpop.permute.xlu0 %2068 }
 0x172   : > { %2110 = vst.msk [vmem:[#allocation2 + $0x38] sm:$0xff] %vm2102_vm8, %v2069_v25 }
 0x174   : > { %v2516_v26 = vpop.permute.xlu1 %2515 }
 0x175   : > { %2550 = vst.msk [vmem:[#allocation2 + $0x70] sm:$0xff] %vm2535_vm9, %v2516_v26  ;;  %v2500_v27 = vpop.permute.xlu0 %2499 }
 0x176   : > { %2542 = vst.msk [vmem:[#allocation2 + $0x30] sm:$0xff] %vm2535_vm9, %v2500_v27 }
 0x178   : > { %v2518_v22 = vpop.permute.xlu1 %2517 }
 0x179   : > { %2551 = vst.msk [vmem:[#allocation2 + $0x78] sm:$0xff] %vm2535_vm9, %v2518_v22  ;;  %v2502_v28 = vpop.permute.xlu0 %2501 }
 0x17a   : > { %2543 = vst.msk [vmem:[#allocation2 + $0x38] sm:$0xff] %vm2535_vm9, %v2502_v28 }
 0x17c   : > { %v2805_v29 = vpop.permute.xlu1 %2804 }
 0x17d   : > { %2839 = vst.msk [vmem:[#allocation2 + $0x70] sm:$0xff] %vm2824_vm10, %v2805_v29  ;;  %v2789_v30 = vpop.permute.xlu0 %2788 }
 0x17e   : > { %2831 = vst.msk [vmem:[#allocation2 + $0x30] sm:$0xff] %vm2824_vm10, %v2789_v30 }
 0x180   : > { %v2807_v31 = vpop.permute.xlu1 %2806 }
 0x181   : > { %2840 = vst.msk [vmem:[#allocation2 + $0x78] sm:$0xff] %vm2824_vm10, %v2807_v31  ;;  %v2791_v63 = vpop.permute.xlu0 %2790 }
 0x182   : > { %2832 = vst.msk [vmem:[#allocation2 + $0x38] sm:$0xff] %vm2824_vm10, %v2791_v63 }
 0x184   : > { %v2855_v32 = vld [vmem:[#allocation2 + $0x70] sm:$0xff] }
 0x185   : > { %4052 = vmatprep.mubr.msk.bf16.mxu1 %vm2884_vm11, %v2855_v32  ;;  %v2847_v33 = vld [vmem:[#allocation2 + $0x30] sm:$0xff] }
 0x186   : > { %4036 = vmatprep.mubr.msk.bf16.mxu0 %vm2884_vm11, %v2847_v33 }
 0x188   : > { %v2856_v34 = vld [vmem:[#allocation2 + $0x78] sm:$0xff] }
 0x189   : > { %4053 = vmatmul.mubr.msk.bf16.gmra.mrb[12].mxu1 %vm2884_vm11, %v2856_v34  ;;  %v2848_v35 = vld [vmem:[#allocation2 + $0x38] sm:$0xff] }
 0x18a   : > { %4037 = vmatmul.mubr.msk.bf16.gmra.mrb[12].mxu0 %vm2884_vm11, %v2848_v35 }
 0x1a0   : > { %v4042_v37 = vpop.f32.mrb[0].mxu1 }
 0x1a1   : > { %v4026_v38 = vpop.f32.mrb[0].mxu0  ;;  %v3035_v39 = vpop.f32.mrb[1].mxu1  ;;  %v3044_v42 = vadd.f32 %v4042_v37, %v5024_v36 }
 0x1a2   : > { %v2971_v40 = vpop.f32.mrb[1].mxu0  ;;  %v4043_v41 = vpop.f32.mrb[2].mxu1  ;;  %v2980_v46 = vadd.f32 %v4026_v38, %v5024_v36  ;;  %v3036_v47 = vadd.f32 %v5024_v36, %v3035_v39 }
 0x1a3   : > { %v4027_v43 = vpop.f32.mrb[2].mxu0  ;;  %v3047_v44 = vadd.f32 %v4043_v41, %v5024_v36  ;;  %v3038_v45 = vpop.f32.mrb[3].mxu1  ;;  %v2972_v51 = vadd.f32 %v5024_v36, %v2971_v40 }
 0x1a4   : > { %v2983_v48 = vadd.f32 %v4027_v43, %v5024_v36  ;;  %v2974_v49 = vpop.f32.mrb[3].mxu0  ;;  %v3039_v50 = vadd.f32 %v5024_v36, %v3038_v45 }
 0x1a5   : > { %v3952_v52 = vpack.c.bf16 %v3047_v44, %v3044_v42  ;;  %v2975_v53 = vadd.f32 %v5024_v36, %v2974_v49 }
 0x1a6   : > { %v3912_v54 = vpack.c.bf16 %v2983_v48, %v2980_v46  ;;  %v3947_v55 = vpack.c.bf16 %v3039_v50, %v3036_v47 }
 0x1a7   : > { %3992 = vst [vmem:[%s5034_s10 + $0x48] sm:$0xff] %v3952_v52   ;;  %v3907_v56 = vpack.c.bf16 %v2975_v53, %v2972_v51 }
 0x1a8   : > { %3984 = vst [vmem:[%s5034_s10 + $0x8] sm:$0xff] %v3912_v54   ;;  %3991 = vst [vmem:[%s5034_s10 + $0x40] sm:$0xff] %v3947_v55  }
 0x1a9   : > { %3908 = vst [vmem:[%s5034_s10] sm:$0xff] %v3907_v56  }
 0x1e0   : > { %v4046_v58 = vpop.f32.mrb[4].mxu1 }
 0x1e1   : > { %v4030_v57 = vpop.f32.mrb[4].mxu0  ;;  %v3051_v60 = vpop.f32.mrb[5].mxu1  ;;  %v3060_v1 = vadd.f32 %v4046_v58, %v5024_v36 }
 0x1e2   : > { %v2987_v59 = vpop.f32.mrb[5].mxu0  ;;  %v4047_v62 = vpop.f32.mrb[6].mxu1  ;;  %v2996_v0 = vadd.f32 %v4030_v57, %v5024_v36  ;;  %v3052_v7 = vadd.f32 %v5024_v36, %v3051_v60 }
 0x1e3   : > { %v4031_v61 = vpop.f32.mrb[6].mxu0  ;;  %v3063_v3 = vadd.f32 %v4047_v62, %v5024_v36  ;;  %v3054_v5 = vpop.f32.mrb[7].mxu1  ;;  %v2988_v6 = vadd.f32 %v5024_v36, %v2987_v59 }
 0x1e4   : > { %v2999_v2 = vadd.f32 %v4031_v61, %v5024_v36  ;;  %v2990_v4 = vpop.f32.mrb[7].mxu0  ;;  %v3055_v9 = vadd.f32 %v5024_v36, %v3054_v5 }
 0x1e5   : > { %v2991_v8 = vadd.f32 %v5024_v36, %v2990_v4  ;;  %v3962_v12 = vpack.c.bf16 %v3063_v3, %v3060_v1 }
 0x1e6   : > { %v3922_v10 = vpack.c.bf16 %v2999_v2, %v2996_v0  ;;  %v3957_v14 = vpack.c.bf16 %v3055_v9, %v3052_v7 }
 0x1e7   : > { %v3917_v13 = vpack.c.bf16 %v2991_v8, %v2988_v6  ;;  %3994 = vst [vmem:[%s5034_s10 + $0x58] sm:$0xff] %v3962_v12  }
 0x1e8   : > { %3986 = vst [vmem:[%s5034_s10 + $0x18] sm:$0xff] %v3922_v10   ;;  %3993 = vst [vmem:[%s5034_s10 + $0x50] sm:$0xff] %v3957_v14  }
 0x1e9   : > { %3985 = vst [vmem:[%s5034_s10 + $0x10] sm:$0xff] %v3917_v13  }
 0x220   : > { %v4050_v15 = vpop.f32.mrb[8].mxu1 }
 0x221   : > { %v3067_v16 = vpop.f32.mrb[9].mxu1  ;;  %v3076_v11 = vadd.f32 %v4050_v15, %v5024_v36  ;;  %v4034_v20 = vpop.f32.mrb[8].mxu0 }
 0x222   : > { %v4051_v17 = vpop.f32.mrb[10].mxu1  ;;  %v3068_v21 = vadd.f32 %v5024_v36, %v3067_v16  ;;  %v3003_v24 = vpop.f32.mrb[9].mxu0  ;;  %v3012_v22 = vadd.f32 %v4034_v20, %v5024_v36 }
 0x223   : > { %v3079_v18 = vadd.f32 %v4051_v17, %v5024_v36  ;;  %v3070_v19 = vpop.f32.mrb[11].mxu1  ;;  %v4035_v26 = vpop.f32.mrb[10].mxu0  ;;  %v3004_v30 = vadd.f32 %v5024_v36, %v3003_v24 }
 0x224   : > { %v3071_v23 = vadd.f32 %v5024_v36, %v3070_v19  ;;  %v3015_v28 = vadd.f32 %v4035_v26, %v5024_v36  ;;  %v3006_v29 = vpop.f32.mrb[11].mxu0 }
 0x225   : > { %v3972_v25 = vpack.c.bf16 %v3079_v18, %v3076_v11  ;;  %v3007_v31 = vadd.f32 %v5024_v36, %v3006_v29 }
 0x226   : > { %v3967_v27 = vpack.c.bf16 %v3071_v23, %v3068_v21  ;;  %v3932_v63 = vpack.c.bf16 %v3015_v28, %v3012_v22 }
 0x227   : > { %3996 = vst [vmem:[%s5034_s10 + $0x68] sm:$0xff] %v3972_v25   ;;  %v3927_v32 = vpack.c.bf16 %v3007_v31, %v3004_v30 }
 0x228   : > { %3995 = vst [vmem:[%s5034_s10 + $0x60] sm:$0xff] %v3967_v27   ;;  %3988 = vst [vmem:[%s5034_s10 + $0x28] sm:$0xff] %v3932_v63  }
 0x229   : > { %3987 = vst [vmem:[%s5034_s10 + $0x20] sm:$0xff] %v3927_v32  }
 0x25c   : > { %v4054_v33 = vpop.f32.mrb[12].mxu1 }
 0x25d   : > { %v3083_v34 = vpop.f32.mrb[13].mxu1  ;;  %v4038_v35 = vpop.f32.mrb[12].mxu0  ;;  %v3092_v38 = vadd.f32 %v4054_v33, %v5024_v36 }
 0x25e   : > { %v4055_v37 = vpop.f32.mrb[14].mxu1  ;;  %v3019_v39 = vpop.f32.mrb[13].mxu0  ;;  %v3084_v42 = vadd.f32 %v5024_v36, %v3083_v34  ;;  %v3028_v45 = vadd.f32 %v4038_v35, %v5024_v36 }
 0x25f   : > { %v3095_v40 = vadd.f32 %v4055_v37, %v5024_v36  ;;  %v3086_v41 = vpop.f32.mrb[15].mxu1  ;;  %v4039_v43 = vpop.f32.mrb[14].mxu0  ;;  %v3020_v49 = vadd.f32 %v5024_v36, %v3019_v39 }
 0x260   : > { %v3087_v44 = vadd.f32 %v5024_v36, %v3086_v41  ;;  %v3031_v46 = vadd.f32 %v4039_v43, %v5024_v36  ;;  %v3022_v48 = vpop.f32.mrb[15].mxu0 }
 0x261   : > { %v3982_v47 = vpack.c.bf16 %v3095_v40, %v3092_v38  ;;  %v3023_v50 = vadd.f32 %v5024_v36, %v3022_v48 }
 0x262   : > { %v3977_v51 = vpack.c.bf16 %v3087_v44, %v3084_v42  ;;  %v3942_v52 = vpack.c.bf16 %v3031_v46, %v3028_v45 }
 0x263   : > { %3998 = vst [vmem:[%s5034_s10 + $0x78] sm:$0xff] %v3982_v47   ;;  %v3937_v53 = vpack.c.bf16 %v3023_v50, %v3020_v49 }
 0x264   : > { %3997 = vst [vmem:[%s5034_s10 + $0x70] sm:$0xff] %v3977_v51   ;;  %3990 = vst [vmem:[%s5034_s10 + $0x38] sm:$0xff] %v3942_v52  }
 0x265   : > { %3989 = vst [vmem:[%s5034_s10 + $0x30] sm:$0xff] %v3937_v53  }
 0x266 PF: > { %s13_s12 = sadd.s32 1, %s4330_s12  }
 0x267   : > { %p10_p4 = scmp.ge.s32.totalorder %s13_s12, 4  }
 0x269   :  { %12 = sbr.rel (!%p10_p4) target bundleno = 1 (0x1), region = 64 }

</bundles_post_ra>
